<compile_context>
chip_gen: v7x
topology: tpu7x:2x2x1
jax: 0.10.0
libtpu: 0.0.40
codegen_flags: <defaults>
</compile_context>

<pallas_src>
import functools

import jax
import jax.numpy as jnp
from jax.experimental import pallas as pl
from jax.experimental.pallas import tpu as pltpu


def _cx_kernel(t_ref, i_ref, mu_row_ref, mu_col_ref, o_ref, tn_ref, rmax_ref,
               *, sigma, b, eps, inv_p):
    # t_ref:      (1, P, C)   raw featureT patch rows for batch n (resident over q)
    # i_ref:      (1, C, TQ)  raw featureI columns for this Q-tile (lane-dense)
    # mu_row_ref: (1, C)      meanT, row layout (broadcast over P)
    # mu_col_ref: (C, 1)      meanT, column layout (broadcast over Q)
    # o_ref:      (1, 1, 1)   per-batch -log(CX) scalar
    # tn_ref:     (P, C)      scratch: centered + L2-normalized featureT
    # rmax_ref:   (P, 1)      scratch: running max_q CX[p, q]
    q_idx = pl.program_id(1)

    @pl.when(q_idx == 0)
    def _init():
        tc = t_ref[0] - mu_row_ref[...]                              # (P, C)
        tn_ref[...] = tc * jax.lax.rsqrt(
            jnp.sum(tc * tc, axis=1, keepdims=True))
        rmax_ref[...] = jnp.zeros_like(rmax_ref)                     # CX >= 0

    # center + channelwise L2-normalize this tile of featureI columns
    xc = i_ref[0] - mu_col_ref[...]                                  # (C, TQ)
    xn = xc * jax.lax.rsqrt(jnp.sum(xc * xc, axis=0, keepdims=True))

    # cosine similarities on the MXU: (P, C) @ (C, TQ) -> (P, TQ)
    s = jnp.dot(tn_ref[...], xn, preferred_element_type=jnp.float32)

    raw = (1.0 - s) * 0.5
    col_min = jnp.min(raw, axis=0, keepdims=True)                    # (1, TQ)
    rel = raw * (1.0 / (col_min + eps))        # one divide per column, then bcast mul
    w = jnp.exp((b - rel) * (1.0 / sigma))
    col_sum = jnp.sum(w, axis=0, keepdims=True)                      # (1, TQ)
    cx = w * pl.reciprocal(col_sum, approx=True)                     # softmax over P
    rmax_ref[...] = jnp.maximum(rmax_ref[...],
                                jnp.max(cx, axis=1, keepdims=True))  # (P, 1)

    @pl.when(q_idx == pl.num_programs(1) - 1)
    def _finalize():
        val = jnp.sum(rmax_ref[...], axis=0, keepdims=True) * inv_p  # (1, 1)
        o_ref[0] = -jnp.log(val)


def cx_loss(featureT, featureI, *, sigma=0.1, b=1.0):
    """Pallas TPU implementation of CXLoss.forward(featureT, featureI)."""
    N, C, Ht, Wt = featureT.shape
    Ni, Ci, Hi, Wi = featureI.shape
    assert N == Ni and C == Ci
    P = Ht * Wt
    Q = Hi * Wi

    ft = featureT.astype(jnp.float32)
    fi = featureI.astype(jnp.float32)

    # Zero-pad channels to a sublane multiple (8).  Zero channels change neither
    # meanT, the channelwise L2 norms, nor the dot products -> bit-faithful.
    Cp = max(8, ((C + 7) // 8) * 8)
    if Cp != C:
        ft = jnp.pad(ft, ((0, 0), (0, Cp - C), (0, 0), (0, 0)))
        fi = jnp.pad(fi, ((0, 0), (0, Cp - C), (0, 0), (0, 0)))

    # meanT: per-channel mean of featureT over batch + spatial (global reduction,
    # done once in the wrapper; the subtraction itself is fused into the kernel
    # so each feature tensor is read from HBM exactly once).
    mean_t = jnp.mean(ft, axis=(0, 2, 3))
    mu_row = mean_t.reshape(1, Cp)
    mu_col = mean_t.reshape(Cp, 1)

    # featureT as (N, P, C) patch rows; featureI as lane-dense (N, C, Q).
    t_flat = jnp.transpose(ft.reshape(N, Cp, P), (0, 2, 1))
    i_flat = fi.reshape(N, Cp, Q)

    # Stream the Q axis in lane-dense tiles; keep P whole so per-column
    # min / softmax over P stay single-pass.
    TQ = 128 if Q % 128 == 0 else Q
    n_q = Q // TQ

    kernel = functools.partial(_cx_kernel, sigma=float(sigma), b=float(b),
                               eps=1e-5, inv_p=1.0 / P)

    per_batch = pl.pallas_call(
        kernel,
        out_shape=jax.ShapeDtypeStruct((N, 1, 1), jnp.float32),
        grid=(N, n_q),
        in_specs=[
            pl.BlockSpec((1, P, Cp), lambda n, q: (n, 0, 0)),   # featureT: resident across q
            pl.BlockSpec((1, Cp, TQ), lambda n, q: (n, 0, q)),  # featureI: streamed Q-tiles
            pl.BlockSpec((1, Cp), lambda n, q: (0, 0)),
            pl.BlockSpec((Cp, 1), lambda n, q: (0, 0)),
        ],
        out_specs=pl.BlockSpec((1, 1, 1), lambda n, q: (n, 0, 0)),
        scratch_shapes=[
            pltpu.VMEM((P, Cp), jnp.float32),   # normalized featureT (computed once per batch)
            pltpu.VMEM((P, 1), jnp.float32),    # running row-max of CX
        ],
        compiler_params=pltpu.CompilerParams(
            dimension_semantics=("parallel", "arbitrary"),
        ),
    )(t_flat, i_flat, mu_row, mu_col)

    return jnp.mean(per_batch)


def cx_loss_ref(featureT, featureI, *, sigma=0.1, b=1.0):
    """Pure-JAX reference mirroring the PyTorch CXLoss.forward."""
    ft = featureT.astype(jnp.float32)
    fi = featureI.astype(jnp.float32)
    mean_t = jnp.mean(ft, axis=(0, 2, 3), keepdims=True)
    ft = ft - mean_t
    fi = fi - mean_t
    ft = ft / jnp.linalg.norm(ft, axis=1, keepdims=True)
    fi = fi / jnp.linalg.norm(fi, axis=1, keepdims=True)
    N, C, Ht, Wt = ft.shape
    _, _, Hi, Wi = fi.shape
    t = ft.reshape(N, C, Ht * Wt)
    x = fi.reshape(N, C, Hi * Wi)
    dist = jnp.einsum("ncp,ncq->npq", t, x,
                      precision=jax.lax.Precision.HIGHEST)
    raw = (1.0 - dist) / 2.0
    rel = raw / (jnp.min(raw, axis=1, keepdims=True) + 1e-5)
    w = jnp.exp((b - rel) / sigma)
    cx = w / jnp.sum(w, axis=1, keepdims=True)
    cx = jnp.max(cx, axis=2)        # max over featureI spatial (W then H == flat q)
    cx = jnp.mean(cx, axis=1)       # mean over P
    return jnp.mean(-jnp.log(cx))


if __name__ == "__main__":
    key = jax.random.PRNGKey(0)
    N, C, H, W = 2, 4, 16, 16
    kT, kI = jax.random.split(key)
    featureT = jax.random.normal(kT, (N, C, H, W), dtype=jnp.float32)
    featureI = jax.random.normal(kI, (N, C, H, W), dtype=jnp.float32)

    loss = cx_loss(featureT, featureI)
    jax.block_until_ready(loss)

    ref = cx_loss_ref(featureT, featureI)
    assert loss.shape == ()
    assert bool(jnp.isfinite(loss)), float(loss)
    # Generous tolerance: the loss passes a min-normalized distance through
    # exp(./0.1), which amplifies tiny matmul/reciprocal rounding differences.
    assert abs(float(loss) - float(ref)) < 5e-2 + 5e-2 * abs(float(ref)), (
        float(loss), float(ref))
    print("KERNEL_OK")
</pallas_src>

<mosaic_0001>
module attributes {stable_mosaic.version = 11 : i64} {
  func.func @_cx_kernel(%arg0: i32, %arg1: i32, %arg2: memref<1x256x8xf32, #tpu.memory_space<vmem>>, %arg3: memref<1x8x128xf32, #tpu.memory_space<vmem>>, %arg4: memref<1x8xf32, #tpu.memory_space<vmem>>, %arg5: memref<8x1xf32, #tpu.memory_space<vmem>>, %arg6: memref<1x1x1xf32, #tpu.memory_space<vmem>>, %arg7: memref<256x8xf32, #tpu.memory_space<vmem>>, %arg8: memref<256x1xf32, #tpu.memory_space<vmem>>) attributes {dimension_semantics = [#tpu.dimension_semantics<parallel>, #tpu.dimension_semantics<arbitrary>], iteration_bounds = array<i64: 2, 2>, scalar_prefetch = 0 : i64, scratch_operands = 2 : i64, tpu.core_type = #tpu.core_type<tc>, window_params = [{transform_indices = @transform_0, window_bounds = array<i64: 1, 256, 8>}, {transform_indices = @transform_1, window_bounds = array<i64: 1, 8, 128>}, {pipeline_mode = #tpu.pipeline_mode<synchronous>, transform_indices = @transform_2, window_bounds = array<i64: 1, 8>}, {pipeline_mode = #tpu.pipeline_mode<synchronous>, transform_indices = @transform_3, window_bounds = array<i64: 8, 1>}, {transform_indices = @transform_4, window_bounds = array<i64: 1, 1, 1>}]} {
    %c0_i32 = arith.constant 0 : i32
    %0 = arith.cmpi eq, %arg1, %c0_i32 : i32
    %1 = arith.extui %0 : i1 to i32
    %c0_i32_0 = arith.constant 0 : i32
    %2 = arith.cmpi ne, %1, %c0_i32_0 : i32
    scf.if %2 {
      %c0_22 = arith.constant 0 : index
      %c0_23 = arith.constant 0 : index
      %c0_24 = arith.constant 0 : index
      %46 = vector.load %arg2[%c0_22, %c0_23, %c0_24] : memref<1x256x8xf32, #tpu.memory_space<vmem>>, vector<1x256x8xf32>
      %47 = vector.shape_cast %46 : vector<1x256x8xf32> to vector<256x8xf32>
      %c0_25 = arith.constant 0 : index
      %c0_26 = arith.constant 0 : index
      %48 = vector.load %arg4[%c0_25, %c0_26] : memref<1x8xf32, #tpu.memory_space<vmem>>, vector<1x8xf32>
      %49 = vector.broadcast %48 : vector<1x8xf32> to vector<256x8xf32>
      %50 = arith.subf %47, %49 : vector<256x8xf32>
      %51 = arith.mulf %50, %50 : vector<256x8xf32>
      %cst_27 = arith.constant dense<0.000000e+00> : vector<256xf32>
      %52 = vector.multi_reduction <add>, %51, %cst_27 [1] : vector<256x8xf32> to vector<256xf32>
      %53 = vector.shape_cast %52 : vector<256xf32> to vector<256x1xf32>
      %54 = math.rsqrt %53 : vector<256x1xf32>
      %55 = vector.broadcast %54 : vector<256x1xf32> to vector<256x8xf32>
      %56 = arith.mulf %50, %55 : vector<256x8xf32>
      %c0_28 = arith.constant 0 : index
      %c0_29 = arith.constant 0 : index
      %57 = vector.load %arg7[%c0_28, %c0_29] : memref<256x8xf32, #tpu.memory_space<vmem>>, vector<256x8xf32>
      tpu.vector_store %arg7[%c0_28, %c0_29], %56 {strides = array<i32>} : memref<256x8xf32, #tpu.memory_space<vmem>>, vector<256x8xf32>,
      %cst_30 = arith.constant 0.000000e+00 : f32
      %58 = vector.broadcast %cst_30 : f32 to vector<256x1xf32>
      %c0_31 = arith.constant 0 : index
      %c0_32 = arith.constant 0 : index
      %59 = vector.load %arg8[%c0_31, %c0_32] : memref<256x1xf32, #tpu.memory_space<vmem>>, vector<256x1xf32>
      tpu.vector_store %arg8[%c0_31, %c0_32], %58 {strides = array<i32>} : memref<256x1xf32, #tpu.memory_space<vmem>>, vector<256x1xf32>,
    } else {
    }
    %c0 = arith.constant 0 : index
    %c0_1 = arith.constant 0 : index
    %c0_2 = arith.constant 0 : index
    %3 = vector.load %arg3[%c0, %c0_1, %c0_2] : memref<1x8x128xf32, #tpu.memory_space<vmem>>, vector<1x8x128xf32>
    %4 = vector.shape_cast %3 : vector<1x8x128xf32> to vector<8x128xf32>
    %c0_3 = arith.constant 0 : index
    %c0_4 = arith.constant 0 : index
    %5 = vector.load %arg5[%c0_3, %c0_4] : memref<8x1xf32, #tpu.memory_space<vmem>>, vector<8x1xf32>
    %6 = vector.broadcast %5 : vector<8x1xf32> to vector<8x128xf32>
    %7 = arith.subf %4, %6 : vector<8x128xf32>
    %8 = arith.mulf %7, %7 : vector<8x128xf32>
    %cst = arith.constant dense<0.000000e+00> : vector<128xf32>
    %9 = vector.multi_reduction <add>, %8, %cst [0] : vector<8x128xf32> to vector<128xf32>
    %10 = vector.shape_cast %9 : vector<128xf32> to vector<1x128xf32>
    %11 = math.rsqrt %10 : vector<1x128xf32>
    %12 = vector.broadcast %11 : vector<1x128xf32> to vector<8x128xf32>
    %13 = arith.mulf %7, %12 : vector<8x128xf32>
    %c0_5 = arith.constant 0 : index
    %c0_6 = arith.constant 0 : index
    %14 = vector.load %arg7[%c0_5, %c0_6] : memref<256x8xf32, #tpu.memory_space<vmem>>, vector<256x8xf32>
    %cst_7 = arith.constant dense<0.000000e+00> : vector<256x128xf32>
    %15 = tpu.matmul %14, %13, %cst_7 {dimension_numbers = #tpu.dot_dimension_numbers<[1], [0], [0], [1], [0, 0, 1, 1], [], []>} : vector<256x8xf32>, vector<8x128xf32>, vector<256x128xf32> -> vector<256x128xf32>
    %cst_8 = arith.constant 1.000000e+00 : f32
    %16 = vector.broadcast %cst_8 : f32 to vector<256x128xf32>
    %17 = arith.subf %16, %15 : vector<256x128xf32>
    %cst_9 = arith.constant 5.000000e-01 : f32
    %18 = vector.broadcast %cst_9 : f32 to vector<256x128xf32>
    %19 = arith.mulf %17, %18 : vector<256x128xf32>
    %cst_10 = arith.constant dense<0x7F800000> : vector<128xf32>
    %20 = vector.multi_reduction <minimumf>, %19, %cst_10 [0] : vector<256x128xf32> to vector<128xf32>
    %21 = vector.shape_cast %20 : vector<128xf32> to vector<1x128xf32>
    %cst_11 = arith.constant 9.99999974E-6 : f32
    %22 = vector.broadcast %cst_11 : f32 to vector<1x128xf32>
    %23 = arith.addf %21, %22 : vector<1x128xf32>
    %cst_12 = arith.constant 1.000000e+00 : f32
    %24 = vector.broadcast %cst_12 : f32 to vector<1x128xf32>
    %25 = arith.divf %24, %23 : vector<1x128xf32>
    %26 = vector.broadcast %25 : vector<1x128xf32> to vector<256x128xf32>
    %27 = arith.mulf %19, %26 : vector<256x128xf32>
    %cst_13 = arith.constant 1.000000e+00 : f32
    %28 = vector.broadcast %cst_13 : f32 to vector<256x128xf32>
    %29 = arith.subf %28, %27 : vector<256x128xf32>
    %cst_14 = arith.constant 1.000000e+01 : f32
    %30 = vector.broadcast %cst_14 : f32 to vector<256x128xf32>
    %31 = arith.mulf %29, %30 : vector<256x128xf32>
    %32 = math.exp %31 : vector<256x128xf32>
    %cst_15 = arith.constant dense<0.000000e+00> : vector<128xf32>
    %33 = vector.multi_reduction <add>, %32, %cst_15 [0] : vector<256x128xf32> to vector<128xf32>
    %34 = vector.shape_cast %33 : vector<128xf32> to vector<1x128xf32>
    %35 = tpu.reciprocal %34 {approx = true} : vector<1x128xf32> -> vector<1x128xf32>
    %36 = vector.broadcast %35 : vector<1x128xf32> to vector<256x128xf32>
    %37 = arith.mulf %32, %36 : vector<256x128xf32>
    %c0_16 = arith.constant 0 : index
    %c0_17 = arith.constant 0 : index
    %38 = vector.load %arg8[%c0_16, %c0_17] : memref<256x1xf32, #tpu.memory_space<vmem>>, vector<256x1xf32>
    %cst_18 = arith.constant dense<0xFF800000> : vector<256xf32>
    %39 = vector.multi_reduction <maximumf>, %37, %cst_18 [1] : vector<256x128xf32> to vector<256xf32>
    %40 = vector.shape_cast %39 : vector<256xf32> to vector<256x1xf32>
    %41 = arith.maximumf %38, %40 : vector<256x1xf32>
    %c0_19 = arith.constant 0 : index
    %c0_20 = arith.constant 0 : index
    %42 = vector.load %arg8[%c0_19, %c0_20] : memref<256x1xf32, #tpu.memory_space<vmem>>, vector<256x1xf32>
    tpu.vector_store %arg8[%c0_19, %c0_20], %41 {strides = array<i32>} : memref<256x1xf32, #tpu.memory_space<vmem>>, vector<256x1xf32>,
    %c1_i32 = arith.constant 1 : i32
    %43 = arith.cmpi eq, %arg1, %c1_i32 : i32
    %44 = arith.extui %43 : i1 to i32
    %c0_i32_21 = arith.constant 0 : i32
    %45 = arith.cmpi ne, %44, %c0_i32_21 : i32
    scf.if %45 {
      %c0_22 = arith.constant 0 : index
      %c0_23 = arith.constant 0 : index
      %46 = vector.load %arg8[%c0_22, %c0_23] : memref<256x1xf32, #tpu.memory_space<vmem>>, vector<256x1xf32>
      %cst_24 = arith.constant dense<0.000000e+00> : vector<1xf32>
      %47 = vector.multi_reduction <add>, %46, %cst_24 [0] : vector<256x1xf32> to vector<1xf32>
      %48 = vector.shape_cast %47 : vector<1xf32> to vector<1x1xf32>
      %cst_25 = arith.constant 3.906250e-03 : f32
      %49 = vector.broadcast %cst_25 : f32 to vector<1x1xf32>
      %50 = arith.mulf %48, %49 : vector<1x1xf32>
      %51 = math.log %50 : vector<1x1xf32>
      %cst_26 = arith.constant 0.000000e+00 : f32
      %52 = vector.broadcast %cst_26 : f32 to vector<1x1xf32>
      %53 = arith.subf %52, %51 : vector<1x1xf32>
      %c0_27 = arith.constant 0 : index
      %c0_28 = arith.constant 0 : index
      %c0_29 = arith.constant 0 : index
      %54 = vector.load %arg6[%c0_27, %c0_28, %c0_29] : memref<1x1x1xf32, #tpu.memory_space<vmem>>, vector<1x1x1xf32>
      %55 = vector.shape_cast %54 : vector<1x1x1xf32> to vector<1x1xf32>
      %56 = vector.shape_cast %53 : vector<1x1xf32> to vector<1x1x1xf32>
      tpu.vector_store %arg6[%c0_27, %c0_28, %c0_29], %56 {strides = array<i32>} : memref<1x1x1xf32, #tpu.memory_space<vmem>>, vector<1x1x1xf32>,
    } else {
    }
    return
  }
  func.func @transform_0(%arg0: i32, %arg1: i32) -> (i32, i32, i32) {
    %c0_i32 = arith.constant 0 : i32
    %c0_i32_0 = arith.constant 0 : i32
    %c0_i32_1 = arith.constant 0 : i32
    return %arg0, %c0_i32, %c0_i32_0 : i32, i32, i32
  }
  func.func @transform_1(%arg0: i32, %arg1: i32) -> (i32, i32, i32) {
    %c0_i32 = arith.constant 0 : i32
    %c0_i32_0 = arith.constant 0 : i32
    return %arg0, %c0_i32, %arg1 : i32, i32, i32
  }
  func.func @transform_2(%arg0: i32, %arg1: i32) -> (i32, i32) {
    %c0_i32 = arith.constant 0 : i32
    %c0_i32_0 = arith.constant 0 : i32
    %c0_i32_1 = arith.constant 0 : i32
    return %c0_i32, %c0_i32_0 : i32, i32
  }
  func.func @transform_3(%arg0: i32, %arg1: i32) -> (i32, i32) {
    %c0_i32 = arith.constant 0 : i32
    %c0_i32_0 = arith.constant 0 : i32
    %c0_i32_1 = arith.constant 0 : i32
    return %c0_i32, %c0_i32_0 : i32, i32
  }
  func.func @transform_4(%arg0: i32, %arg1: i32) -> (i32, i32, i32) {
    %c0_i32 = arith.constant 0 : i32
    %c0_i32_0 = arith.constant 0 : i32
    %c0_i32_1 = arith.constant 0 : i32
    return %arg0, %c0_i32, %c0_i32_0 : i32, i32, i32
  }
}

</mosaic_0001>

<bundles_post_ra>
// kernel: tpu_custom_call.1
= control target key start
LH: loop header
LB: loop body
LE: loop exit
PB: predicated region body
PF: predicated region fallthrough
CT: control target
= control target key end

     0   :  { %s2001_s15 = smov 0   ;;  %s2003_s16 = smov 0   ;;  %s2766_s0 = inlined_call_operand.vmem [shape: f32[2,256,8], index: 0, kind: input, shape index: {}]   ;;  %s2767_s1 = inlined_call_operand.vmem [shape: f32[2,8,256], index: 1, kind: input, shape index: {}]   ;;  %s2768_s2 = inlined_call_operand.vmem [shape: f32[1,8], index: 2, kind: input, shape index: {}]   ;;  %s2769_s3 = inlined_call_operand.vmem [shape: f32[8,1], index: 3, kind: input, shape index: {}]   ;;  %s2770_s4 = inlined_call_operand.vmem [shape: f32[2,1,1], index: 4, kind: output, shape index: {}]  }
   0x1   :  { %s2005_s17 = smov 0   ;;  %s2007_s18 = smov 0  }
   0x2   :  { %s2009_s19 = smov 0  }
   0x3 LB: > { %s23_s20 = sadd.s32 1, %s1964_s17  ;;  %s26_s21 = sadd.s32 1, %s1968_s18  ;;  %s1972_s19 = sphi %s2009_s19, %s14_s19   ;;  %s1968_s18 = sphi %s2007_s18, %s2774_s18   ;;  %s1964_s17 = sphi %s2005_s17, %s2773_s17   ;;  %s1960_s16 = sphi %s2003_s16, %s2772_s16   ;;  %s1956_s15 = sphi %s2001_s15, %s2771_s15  }
   0x4   : > { %p24_p0 = scmp.ge.s32.totalorder %s23_s20, 2  ;;  %p1627_p1 = scmp.ge.s32.totalorder %s1972_s19, 1 }
   0x5   : > { %p189_p2 = scmp.lt.s32.totalorder %s1972_s19, 5 }
   0x6   : > { %s2776_s20 = smov (%p24_p0, %s23_s20), 0  ;;  %s2778_s21 = smov (!%p24_p0, %s26_s21), %s1968_s18 }
   0x7   : > { %p190_p3 = pnand %p1627_p1, %p189_p2  ;;  %p28_p4 = scmp.ge.s32.totalorder %s2778_s21, 2 }
   0x8   : > { %p221_p5 = scmp.lt.s32.totalorder (!%p190_p3), %s1960_s16, 1  ;;  %p228_p6 = scmp.lt.s32.totalorder (!%p190_p3), %s1956_s15, 1 }
   0x9   : > { %s2780_s21 = smov (%p28_p4, %s2778_s21), 0  ;;  %193 = sbr.rel (%p190_p3) target bundleno = 1075 (0x433), region = 36 }
   0xa   : > { %p1632_p7 = scmp.ne.s32.totalorder (!%p190_p3), %s1956_s15, 0 }
  0x10   : > { %s2782_s16 = smov (!%p221_p5, %s1960_s16), 1  ;;  %240 = sbr.rel (%p1632_p7) target bundleno = 243 (0xf3), region = 40 }
  0x11   : > { %s229_s22 = scalar_select %p228_p6, %s1956_s15, 1 }
  0x12   : > { %s1669_s23 = sshll.u32 %s2782_s16, 8  ;;  %s1630_s24 = sshll.u32 %s2782_s16, 1  ;;  %v2058_v1 = vld [vmem:[%s2768_s2] ss:$0 sm:$0xff] (!%p1632_p7)  ;;  %vm344_vm0 = vcmask (!%p1632_p7), 64512   ;;  %vm537_vm1 = vcmask (!%p1632_p7), 7168  }
  0x13   : > { %s2042_s27 = scalar_lea.vmem %s2766_s0, %s1669_s23  ;;  %s231_s28 = sadd.s32 %s1630_s24, %s229_s22 }
  0x14   : > { %s1631_s29 = sshll.u32 %s231_s28, 3  ;;  %s236_s6 = scalar_lea.vmem %s2770_s4, %s2782_s16  ;;  %v243_v0 = vld [vmem:[%s2042_s27 + $0x10] sm:$0xff] (!%p1632_p7)  ;;  %v241_v2 = vld [vmem:[%s2042_s27] sm:$0xff] (!%p1632_p7)  ;;  %v244_v5 = vld [vmem:[%s2042_s27 + $0x18] sm:$0xff] (!%p1632_p7) }
  0x15   : > { %s2051_s9 = scalar_lea.vmem %s2767_s1, %s1631_s29  ;;  %v2062_v3 = vsub.f32 (!%p1632_p7), %v243_v0, %v2058_v1  ;;  %v2065_v4 = vsub.f32 (!%p1632_p7), %v241_v2, %v2058_v1  ;;  %v242_v6 = vld [vmem:[%s2042_s27 + $0x8] sm:$0xff] (!%p1632_p7)  ;;  %v2071_v8 = vsub.f32 (!%p1632_p7), %v244_v5, %v2058_v1  ;;  %v245_v10 = vld [vmem:[%s2042_s27 + $0x20] sm:$0xff] (!%p1632_p7)  ;;  %v248_v15 = vld [vmem:[%s2042_s27 + $0x38] sm:$0xff] (!%p1632_p7) }
  0x16   : > { %v246_v7 = vld [vmem:[%s2042_s27 + $0x28] sm:$0xff] (!%p1632_p7)  ;;  %v2074_v9 = vsub.f32 (!%p1632_p7), %v242_v6, %v2058_v1  ;;  %v2085_v14 = vsub.f32 (!%p1632_p7), %v245_v10, %v2058_v1  ;;  %v247_v16 = vld [vmem:[%s2042_s27 + $0x30] sm:$0xff] (!%p1632_p7)  ;;  %v2096_v21 = vsub.f32 (!%p1632_p7), %v248_v15, %v2058_v1  ;;  %v249_v28 = vld [vmem:[%s2042_s27 + $0x40] sm:$0xff] (!%p1632_p7) }
  0x17   : > { %v314_v11 = vmul.f32 %v2062_v3, %v2062_v3  ;;  %v312_v12 = vmul.f32 %v2065_v4, %v2065_v4  ;;  %v2082_v13 = vsub.f32 %v246_v7, %v2058_v1  ;;  %v315_v17 = vmul.f32 %v2071_v8, %v2071_v8  ;;  %v250_v27 = vld [vmem:[%s2042_s27 + $0x48] sm:$0xff]  ;;  %v252_v35 = vld [vmem:[%s2042_s27 + $0x58] sm:$0xff]  ;;  %v251_v36 = vld [vmem:[%s2042_s27 + $0x50] sm:$0xff] }
  0x18   : > { %v313_v18 = vmul.f32 %v2074_v9, %v2074_v9  ;;  %v2099_v22 = vsub.f32 %v247_v16, %v2058_v1  ;;  %v316_v26 = vmul.f32 %v2085_v14, %v2085_v14  ;;  %v319_v29 = vmul.f32 %v2096_v21, %v2096_v21  ;;  %v254_v43 = vld [vmem:[%s2042_s27 + $0x68] sm:$0xff]  ;;  %v253_v44 = vld [vmem:[%s2042_s27 + $0x60] sm:$0xff]  ;;  %v256_v51 = vld [vmem:[%s2042_s27 + $0x78] sm:$0xff] }
  0x19   : > { %v351_v19 = vsel %vm344_vm0, %v314_v11, 0.0  ;;  %v345_v20 = vsel %vm344_vm0, %v312_v12, 0.0  ;;  %v354_v23 = vsel %vm344_vm0, %v315_v17, 0.0  ;;  %v317_v25 = vmul.f32 %v2082_v13, %v2082_v13  ;;  %v255_v52 = vld [vmem:[%s2042_s27 + $0x70] sm:$0xff]  ;;  %v258_v59 = vld [vmem:[%s2042_s27 + $0x88] sm:$0xff]  ;;  %v257_v60 = vld [vmem:[%s2042_s27 + $0x80] sm:$0xff] }
  0x1a   : > { %352 = vadd.xlane.f32.xlu1 %v351_v19  ;;  %346 = vadd.xlane.f32.xlu0 %v345_v20  ;;  %v348_v24 = vsel %vm344_vm0, %v313_v18, 0.0  ;;  %v318_v30 = vmul.f32 %v2099_v22, %v2099_v22  ;;  %v357_v32 = vsel %vm344_vm0, %v316_v26, 0.0  ;;  %v2116_v33 = vsub.f32 %v250_v27, %v2058_v1  ;;  %v260_v6 = vld [vmem:[%s2042_s27 + $0x98] sm:$0xff]  ;;  %v259_v7 = vld [vmem:[%s2042_s27 + $0x90] sm:$0xff]  ;;  %v262_v18 = vld [vmem:[%s2042_s27 + $0xa8] sm:$0xff] }
  0x1b   : > { %v360_v31 = vsel %vm344_vm0, %v317_v25, 0.0  ;;  %v2119_v34 = vsub.f32 %v249_v28, %v2058_v1  ;;  %v366_v37 = vsel %vm344_vm0, %v319_v29, 0.0  ;;  %v2130_v41 = vsub.f32 %v252_v35, %v2058_v1  ;;  %v261_v19 = vld [vmem:[%s2042_s27 + $0xa0] sm:$0xff]  ;;  %v264_v28 = vld [vmem:[%s2042_s27 + $0xb8] sm:$0xff]  ;;  %v263_v29 = vld [vmem:[%s2042_s27 + $0xb0] sm:$0xff] }
  0x1c   : > { %v363_v38 = vsel %vm344_vm0, %v318_v30, 0.0  ;;  %v321_v39 = vmul.f32 %v2116_v33, %v2116_v33  ;;  %v2133_v42 = vsub.f32 %v251_v36, %v2058_v1  ;;  %v2138_v45 = vsub.f32 %v254_v43, %v2058_v1 }
  0x1d   : > { %v320_v40 = vmul.f32 %v2119_v34, %v2119_v34  ;;  %v2141_v46 = vsub.f32 %v253_v44, %v2058_v1  ;;  %v323_v49 = vmul.f32 %v2130_v41, %v2130_v41  ;;  %v2154_v54 = vsub.f32 %v256_v51, %v2058_v1  ;;  %v267_v51 = vld [vmem:[%s2042_s27 + $0xd0] sm:$0xff] }
  0x1e   : > { %355 = vadd.xlane.f32.xlu1 %v354_v23  ;;  %349 = vadd.xlane.f32.xlu0 %v348_v24  ;;  %v372_v47 = vsel %vm344_vm0, %v321_v39, 0.0  ;;  %v322_v50 = vmul.f32 %v2133_v42, %v2133_v42  ;;  %v325_v53 = vmul.f32 %v2138_v45, %v2138_v45  ;;  %v2161_v58 = vsub.f32 %v255_v52, %v2058_v1  ;;  %v265_v39 = vld [vmem:[%s2042_s27 + $0xc0] sm:$0xff] }
  0x1f   : > { %v369_v48 = vsel %vm344_vm0, %v320_v40, 0.0  ;;  %v378_v55 = vsel %vm344_vm0, %v323_v49, 0.0  ;;  %v324_v57 = vmul.f32 %v2141_v46, %v2141_v46  ;;  %v327_v62 = vmul.f32 %v2154_v54, %v2154_v54 }
  0x20   : > { %v375_v56 = vsel %vm344_vm0, %v322_v50, 0.0  ;;  %v384_v61 = vsel %vm344_vm0, %v325_v53, 0.0  ;;  %v326_v0 = vmul.f32 %v2161_v58, %v2161_v58  ;;  %v2172_v2 = vsub.f32 %v258_v59, %v2058_v1  ;;  %v268_v50 = vld [vmem:[%s2042_s27 + $0xd8] sm:$0xff] }
  0x21   : > { %v381_v63 = vsel %vm344_vm0, %v324_v57, 0.0  ;;  %v2175_v5 = vsub.f32 %v257_v60, %v2058_v1  ;;  %v390_v10 = vsel %vm344_vm0, %v327_v62, 0.0  ;;  %v2181_v11 = vsub.f32 %v260_v6, %v2058_v1  ;;  %v270_v60 = vld [vmem:[%s2042_s27 + $0xe8] sm:$0xff] }
  0x22   : > { %361 = vadd.xlane.f32.xlu1 %v360_v31  ;;  %358 = vadd.xlane.f32.xlu0 %v357_v32  ;;  %v387_v12 = vsel %vm344_vm0, %v326_v0, 0.0  ;;  %v329_v15 = vmul.f32 %v2172_v2, %v2172_v2  ;;  %v2189_v17 = vsub.f32 %v259_v7, %v2058_v1  ;;  %v2194_v20 = vsub.f32 %v262_v18, %v2058_v1 }
  0x23   : > { %v328_v16 = vmul.f32 %v2175_v5, %v2175_v5  ;;  %v2197_v23 = vsub.f32 %v261_v19, %v2058_v1  ;;  %v331_v26 = vmul.f32 %v2181_v11, %v2181_v11  ;;  %v2210_v31 = vsub.f32 %v264_v28, %v2058_v1 }
  0x24   : > { %v396_v24 = vsel %vm344_vm0, %v329_v15, 0.0  ;;  %v330_v27 = vmul.f32 %v2189_v17, %v2189_v17  ;;  %v333_v30 = vmul.f32 %v2194_v20, %v2194_v20  ;;  %v2231_v49 = vsub.f32 %v265_v39, %v2058_v1  ;;  %v271_v15 = vld [vmem:[%s2042_s27 + $0xf0] sm:$0xff] }
  0x25   : > { %v393_v25 = vsel %vm344_vm0, %v328_v16, 0.0  ;;  %v402_v32 = vsel %vm344_vm0, %v331_v26, 0.0  ;;  %v332_v36 = vmul.f32 %v2197_v23, %v2197_v23  ;;  %v335_v43 = vmul.f32 %v2210_v31, %v2210_v31 }
  0x26   : > { %367 = vadd.xlane.f32.xlu1 %v366_v37  ;;  %364 = vadd.xlane.f32.xlu0 %v363_v38  ;;  %v399_v35 = vsel %vm344_vm0, %v330_v27, 0.0  ;;  %v2217_v37 = vsub.f32 %v263_v29, %v2058_v1  ;;  %v266_v38 = vld [vmem:[%s2042_s27 + $0xc8] sm:$0xff]  ;;  %v408_v40 = vsel %vm344_vm0, %v333_v30, 0.0  ;;  %v2237_v53 = vsub.f32 %v268_v50, %v2058_v1 }
  0x27   : > { %v405_v44 = vsel %vm344_vm0, %v332_v36, 0.0  ;;  %v414_v52 = vsel %vm344_vm0, %v335_v43, 0.0  ;;  %v336_v57 = vmul.f32 %v2231_v49, %v2231_v49  ;;  %v2245_v59 = vsub.f32 %v267_v51, %v2058_v1 }
  0x28   : > { %v2250_v62 = vsub.f32 %v270_v60, %v2058_v1  ;;  %v339_v7 = vmul.f32 %v2237_v53, %v2237_v53  ;;  %v2273_v26 = vsub.f32 %v271_v15, %v2058_v1 }
  0x29   : > { %v417_v6 = vsel %vm344_vm0, %v336_v57, 0.0 }
  0x2a   : > { %373 = vadd.xlane.f32.xlu1 %v372_v47  ;;  %370 = vadd.xlane.f32.xlu0 %v369_v48  ;;  %v334_v47 = vmul.f32 %v2217_v37, %v2217_v37  ;;  %v2228_v48 = vsub.f32 %v266_v38, %v2058_v1  ;;  %v341_v16 = vmul.f32 %v2250_v62, %v2250_v62  ;;  %v426_v19 = vsel %vm344_vm0, %v339_v7, 0.0 }
  0x2b   : > { %v342_v30 = vmul.f32 %v2273_v26, %v2273_v26 }
  0x2c   : > { %v432_v27 = vsel %vm344_vm0, %v341_v16, 0.0 }
  0x2e   : > { %379 = vadd.xlane.f32.xlu1 %v378_v55  ;;  %376 = vadd.xlane.f32.xlu0 %v375_v56  ;;  %v411_v55 = vsel %vm344_vm0, %v334_v47, 0.0  ;;  %v337_v56 = vmul.f32 %v2228_v48, %v2228_v48 }
  0x30   : > { %v420_v0 = vsel %vm344_vm0, %v337_v56, 0.0 }
  0x32   : > { %385 = vadd.xlane.f32.xlu1 %v384_v61  ;;  %382 = vadd.xlane.f32.xlu0 %v381_v63  ;;  %v269_v61 = vld [vmem:[%s2042_s27 + $0xe0] sm:$0xff] }
  0x33   : > { %v2253_v63 = vsub.f32 %v269_v61, %v2058_v1 }
  0x36   : > { %391 = vadd.xlane.f32.xlu1 %v390_v10  ;;  %388 = vadd.xlane.f32.xlu0 %v387_v12  ;;  %v338_v10 = vmul.f32 %v2245_v59, %v2245_v59  ;;  %v272_v12 = vld [vmem:[%s2042_s27 + $0xf8] sm:$0xff] }
  0x37   : > { %v2266_v18 = vsub.f32 %v272_v12, %v2058_v1  ;;  %v1974_v1 = vmov 0.0  }
  0x38   : > { %538 = vst.msk [vmem:[#allocation3] sm:$0xff] %vm537_vm1, %v1974_v1  ;;  %539 = vst.msk [vmem:[#allocation3 + $0x8] sm:$0xff] %vm537_vm1, %v1974_v1 }
  0x39   : > { %v343_v29 = vmul.f32 %v2266_v18, %v2266_v18  ;;  %540 = vst.msk [vmem:[#allocation3 + $0x10] sm:$0xff] %vm537_vm1, %v1974_v1  ;;  %541 = vst.msk [vmem:[#allocation3 + $0x18] sm:$0xff] %vm537_vm1, %v1974_v1 }
  0x3a   : > { %397 = vadd.xlane.f32.xlu1 %v396_v24  ;;  %394 = vadd.xlane.f32.xlu0 %v393_v25  ;;  %v423_v24 = vsel %vm344_vm0, %v338_v10, 0.0  ;;  %v340_v25 = vmul.f32 %v2253_v63, %v2253_v63  ;;  %542 = vst.msk [vmem:[#allocation3 + $0x20] sm:$0xff] %vm537_vm1, %v1974_v1  ;;  %543 = vst.msk [vmem:[#allocation3 + $0x28] sm:$0xff] %vm537_vm1, %v1974_v1 }
  0x3b   : > { %544 = vst.msk [vmem:[#allocation3 + $0x30] sm:$0xff] %vm537_vm1, %v1974_v1  ;;  %545 = vst.msk [vmem:[#allocation3 + $0x38] sm:$0xff] %vm537_vm1, %v1974_v1 }
  0x3c   : > { %v429_v28 = vsel %vm344_vm0, %v340_v25, 0.0  ;;  %546 = vst.msk [vmem:[#allocation3 + $0x40] sm:$0xff] %vm537_vm1, %v1974_v1  ;;  %547 = vst.msk [vmem:[#allocation3 + $0x48] sm:$0xff] %vm537_vm1, %v1974_v1 }
  0x3d   : > { %548 = vst.msk [vmem:[#allocation3 + $0x50] sm:$0xff] %vm537_vm1, %v1974_v1  ;;  %549 = vst.msk [vmem:[#allocation3 + $0x58] sm:$0xff] %vm537_vm1, %v1974_v1 }
  0x3e   : > { %403 = vadd.xlane.f32.xlu1 %v402_v32  ;;  %400 = vadd.xlane.f32.xlu0 %v399_v35  ;;  %v438_v32 = vsel %vm344_vm0, %v343_v29, 0.0  ;;  %v435_v35 = vsel %vm344_vm0, %v342_v30, 0.0  ;;  %550 = vst.msk [vmem:[#allocation3 + $0x60] sm:$0xff] %vm537_vm1, %v1974_v1  ;;  %551 = vst.msk [vmem:[#allocation3 + $0x68] sm:$0xff] %vm537_vm1, %v1974_v1 }
  0x3f   : > { %552 = vst.msk [vmem:[#allocation3 + $0x70] sm:$0xff] %vm537_vm1, %v1974_v1  ;;  %553 = vst.msk [vmem:[#allocation3 + $0x78] sm:$0xff] %vm537_vm1, %v1974_v1 }
  0x40   : > { %554 = vst.msk [vmem:[#allocation3 + $0x80] sm:$0xff] %vm537_vm1, %v1974_v1  ;;  %555 = vst.msk [vmem:[#allocation3 + $0x88] sm:$0xff] %vm537_vm1, %v1974_v1 }
  0x41   : > { %556 = vst.msk [vmem:[#allocation3 + $0x90] sm:$0xff] %vm537_vm1, %v1974_v1  ;;  %557 = vst.msk [vmem:[#allocation3 + $0x98] sm:$0xff] %vm537_vm1, %v1974_v1 }
  0x42   : > { %409 = vadd.xlane.f32.xlu1 %v408_v40  ;;  %406 = vadd.xlane.f32.xlu0 %v405_v44  ;;  %558 = vst.msk [vmem:[#allocation3 + $0xa0] sm:$0xff] %vm537_vm1, %v1974_v1  ;;  %559 = vst.msk [vmem:[#allocation3 + $0xa8] sm:$0xff] %vm537_vm1, %v1974_v1 }
  0x43   : > { %560 = vst.msk [vmem:[#allocation3 + $0xb0] sm:$0xff] %vm537_vm1, %v1974_v1  ;;  %561 = vst.msk [vmem:[#allocation3 + $0xb8] sm:$0xff] %vm537_vm1, %v1974_v1 }
  0x44   : > { %562 = vst.msk [vmem:[#allocation3 + $0xc0] sm:$0xff] %vm537_vm1, %v1974_v1  ;;  %563 = vst.msk [vmem:[#allocation3 + $0xc8] sm:$0xff] %vm537_vm1, %v1974_v1 }
  0x45   : > { %564 = vst.msk [vmem:[#allocation3 + $0xd0] sm:$0xff] %vm537_vm1, %v1974_v1  ;;  %565 = vst.msk [vmem:[#allocation3 + $0xd8] sm:$0xff] %vm537_vm1, %v1974_v1 }
  0x46   : > { %415 = vadd.xlane.f32.xlu1 %v414_v52  ;;  %412 = vadd.xlane.f32.xlu0 %v411_v55  ;;  %566 = vst.msk [vmem:[#allocation3 + $0xe0] sm:$0xff] %vm537_vm1, %v1974_v1  ;;  %567 = vst.msk [vmem:[#allocation3 + $0xe8] sm:$0xff] %vm537_vm1, %v1974_v1 }
  0x47   : > { %568 = vst.msk [vmem:[#allocation3 + $0xf0] sm:$0xff] %vm537_vm1, %v1974_v1  ;;  %569 = vst.msk [vmem:[#allocation3 + $0xf8] sm:$0xff] %vm537_vm1, %v1974_v1 }
  0x4a   : > { %421 = vadd.xlane.f32.xlu1 %v420_v0  ;;  %418 = vadd.xlane.f32.xlu0 %v417_v6 }
  0x4e   : > { %427 = vadd.xlane.f32.xlu1 %v426_v19  ;;  %424 = vadd.xlane.f32.xlu0 %v423_v24 }
  0x52   : > { %433 = vadd.xlane.f32.xlu1 %v432_v27  ;;  %430 = vadd.xlane.f32.xlu0 %v429_v28 }
  0x56   : > { %439 = vadd.xlane.f32.xlu1 %v438_v32  ;;  %436 = vadd.xlane.f32.xlu0 %v435_v35 }
  0xa7   : > { %v353_v36 = vpop.xlane.xlu1 %352  ;;  %v347_v38 = vpop.xlane.xlu0 %346 }
  0xa8   : > { %1797 = vrsqrt.f32 %v353_v36 }
  0xa9   : > { %1799 = vrsqrt.f32 %v347_v38 }
  0xab   : > { %v356_v39 = vpop.xlane.xlu1 %355  ;;  %v350_v40 = vpop.xlane.xlu0 %349 }
  0xac   : > { %1801 = vrsqrt.f32 %v356_v39 }
  0xad   : > { %1803 = vrsqrt.f32 %v350_v40 }
  0xaf   : > { %v362_v43 = vpop.xlane.xlu1 %361  ;;  %v359_v44 = vpop.xlane.xlu0 %358 }
  0xb0   : > { %1805 = vrsqrt.f32 %v362_v43 }
  0xb1   : > { %1807 = vrsqrt.f32 %v359_v44 }
  0xb2   : > { %v1798_v47 = vpop.eup %1797 }
  0xb3   : > { %v1800_v50 = vpop.eup %1799  ;;  %v475_v51 = vmul.f32 %v1798_v47, %v2062_v3  ;;  %v368_v52 = vpop.xlane.xlu1 %367 }
  0xb4   : > { %v365_v55 = vpop.xlane.xlu0 %364  ;;  %v473_v56 = vmul.f32 %v1800_v50, %v2065_v4  ;;  %1809 = vrsqrt.f32 %v368_v52 }
  0xb5   : > { %507 = vst.msk [vmem:[#allocation2 + $0x10] sm:$0xff] %vm344_vm0, %v475_v51  ;;  %1811 = vrsqrt.f32 %v365_v55 }
  0xb6   : > { %v1802_v57 = vpop.eup %1801  ;;  %505 = vst.msk [vmem:[#allocation2] sm:$0xff] %vm344_vm0, %v473_v56 }
  0xb7   : > { %v1804_v60 = vpop.eup %1803  ;;  %v476_v61 = vmul.f32 %v1802_v57, %v2071_v8  ;;  %v374_v0 = vpop.xlane.xlu1 %373 }
  0xb8   : > { %v371_v6 = vpop.xlane.xlu0 %370  ;;  %v474_v7 = vmul.f32 %v1804_v60, %v2074_v9  ;;  %1813 = vrsqrt.f32 %v374_v0 }
  0xb9   : > { %508 = vst.msk [vmem:[#allocation2 + $0x18] sm:$0xff] %vm344_vm0, %v476_v61  ;;  %1815 = vrsqrt.f32 %v371_v6 }
  0xba   : > { %v1806_v3 = vpop.eup %1805  ;;  %506 = vst.msk [vmem:[#allocation2 + $0x8] sm:$0xff] %vm344_vm0, %v474_v7 }
  0xbb   : > { %v1808_v4 = vpop.eup %1807  ;;  %v478_v10 = vmul.f32 %v1806_v3, %v2082_v13  ;;  %v380_v12 = vpop.xlane.xlu1 %379 }
  0xbc   : > { %v377_v15 = vpop.xlane.xlu0 %376  ;;  %v477_v16 = vmul.f32 %v1808_v4, %v2085_v14  ;;  %1817 = vrsqrt.f32 %v380_v12 }
  0xbd   : > { %510 = vst.msk [vmem:[#allocation2 + $0x28] sm:$0xff] %vm344_vm0, %v478_v10  ;;  %1819 = vrsqrt.f32 %v377_v15 }
  0xbe   : > { %v1810_v8 = vpop.eup %1809  ;;  %509 = vst.msk [vmem:[#allocation2 + $0x20] sm:$0xff] %vm344_vm0, %v477_v16 }
  0xbf   : > { %v1812_v9 = vpop.eup %1811  ;;  %v480_v19 = vmul.f32 %v1810_v8, %v2096_v21  ;;  %v386_v24 = vpop.xlane.xlu1 %385 }
  0xc0   : > { %v383_v25 = vpop.xlane.xlu0 %382  ;;  %v479_v27 = vmul.f32 %v1812_v9, %v2099_v22  ;;  %1821 = vrsqrt.f32 %v386_v24 }
  0xc1   : > { %512 = vst.msk [vmem:[#allocation2 + $0x38] sm:$0xff] %vm344_vm0, %v480_v19  ;;  %1823 = vrsqrt.f32 %v383_v25 }
  0xc2   : > { %v1814_v13 = vpop.eup %1813  ;;  %511 = vst.msk [vmem:[#allocation2 + $0x30] sm:$0xff] %vm344_vm0, %v479_v27 }
  0xc3   : > { %v1816_v14 = vpop.eup %1815  ;;  %v482_v28 = vmul.f32 %v1814_v13, %v2116_v33  ;;  %v392_v29 = vpop.xlane.xlu1 %391 }
  0xc4   : > { %v389_v30 = vpop.xlane.xlu0 %388  ;;  %v481_v32 = vmul.f32 %v1816_v14, %v2119_v34  ;;  %1825 = vrsqrt.f32 %v392_v29 }
  0xc5   : > { %514 = vst.msk [vmem:[#allocation2 + $0x48] sm:$0xff] %vm344_vm0, %v482_v28  ;;  %1827 = vrsqrt.f32 %v389_v30 }
  0xc6   : > { %v1818_v21 = vpop.eup %1817  ;;  %513 = vst.msk [vmem:[#allocation2 + $0x40] sm:$0xff] %vm344_vm0, %v481_v32 }
  0xc7   : > { %v1820_v22 = vpop.eup %1819  ;;  %v484_v35 = vmul.f32 %v1818_v21, %v2130_v41  ;;  %v398_v1 = vpop.xlane.xlu1 %397 }
  0xc8   : > { %v395_v36 = vpop.xlane.xlu0 %394  ;;  %v483_v38 = vmul.f32 %v1820_v22, %v2133_v42  ;;  %1829 = vrsqrt.f32 %v398_v1 }
  0xc9   : > { %516 = vst.msk [vmem:[#allocation2 + $0x58] sm:$0xff] %vm344_vm0, %v484_v35  ;;  %1831 = vrsqrt.f32 %v395_v36 }
  0xca   : > { %v1822_v33 = vpop.eup %1821  ;;  %515 = vst.msk [vmem:[#allocation2 + $0x50] sm:$0xff] %vm344_vm0, %v483_v38 }
  0xcb   : > { %v1824_v34 = vpop.eup %1823  ;;  %v486_v39 = vmul.f32 %v1822_v33, %v2138_v45  ;;  %v404_v40 = vpop.xlane.xlu1 %403 }
  0xcc   : > { %v401_v43 = vpop.xlane.xlu0 %400  ;;  %v485_v44 = vmul.f32 %v1824_v34, %v2141_v46  ;;  %1833 = vrsqrt.f32 %v404_v40 }
  0xcd   : > { %518 = vst.msk [vmem:[#allocation2 + $0x68] sm:$0xff] %vm344_vm0, %v486_v39  ;;  %1835 = vrsqrt.f32 %v401_v43 }
  0xce   : > { %v1826_v41 = vpop.eup %1825  ;;  %517 = vst.msk [vmem:[#allocation2 + $0x60] sm:$0xff] %vm344_vm0, %v485_v44 }
  0xcf   : > { %v1828_v42 = vpop.eup %1827  ;;  %v488_v47 = vmul.f32 %v1826_v41, %v2154_v54  ;;  %v410_v50 = vpop.xlane.xlu1 %409 }
  0xd0   : > { %v407_v51 = vpop.xlane.xlu0 %406  ;;  %v487_v52 = vmul.f32 %v1828_v42, %v2161_v58  ;;  %1837 = vrsqrt.f32 %v410_v50 }
  0xd1   : > { %520 = vst.msk [vmem:[#allocation2 + $0x78] sm:$0xff] %vm344_vm0, %v488_v47  ;;  %1839 = vrsqrt.f32 %v407_v51 }
  0xd2   : > { %v1830_v45 = vpop.eup %1829  ;;  %519 = vst.msk [vmem:[#allocation2 + $0x70] sm:$0xff] %vm344_vm0, %v487_v52 }
  0xd3   : > { %v1832_v46 = vpop.eup %1831  ;;  %v490_v55 = vmul.f32 %v1830_v45, %v2172_v2  ;;  %v416_v56 = vpop.xlane.xlu1 %415 }
  0xd4   : > { %v413_v57 = vpop.xlane.xlu0 %412  ;;  %v489_v60 = vmul.f32 %v1832_v46, %v2175_v5  ;;  %1841 = vrsqrt.f32 %v416_v56 }
  0xd5   : > { %522 = vst.msk [vmem:[#allocation2 + $0x88] sm:$0xff] %vm344_vm0, %v490_v55  ;;  %1843 = vrsqrt.f32 %v413_v57 }
  0xd6   : > { %v1834_v54 = vpop.eup %1833  ;;  %521 = vst.msk [vmem:[#allocation2 + $0x80] sm:$0xff] %vm344_vm0, %v489_v60 }
  0xd7   : > { %v1836_v58 = vpop.eup %1835  ;;  %v492_v61 = vmul.f32 %v1834_v54, %v2181_v11  ;;  %v422_v0 = vpop.xlane.xlu1 %421 }
  0xd8   : > { %v419_v6 = vpop.xlane.xlu0 %418  ;;  %v491_v7 = vmul.f32 %v1836_v58, %v2189_v17  ;;  %1845 = vrsqrt.f32 %v422_v0 }
  0xd9   : > { %524 = vst.msk [vmem:[#allocation2 + $0x98] sm:$0xff] %vm344_vm0, %v492_v61  ;;  %1847 = vrsqrt.f32 %v419_v6 }
  0xda   : > { %v1838_v2 = vpop.eup %1837  ;;  %523 = vst.msk [vmem:[#allocation2 + $0x90] sm:$0xff] %vm344_vm0, %v491_v7 }
  0xdb   : > { %v1840_v5 = vpop.eup %1839  ;;  %v494_v3 = vmul.f32 %v1838_v2, %v2194_v20  ;;  %v428_v4 = vpop.xlane.xlu1 %427 }
  0xdc   : > { %v425_v10 = vpop.xlane.xlu0 %424  ;;  %v493_v12 = vmul.f32 %v1840_v5, %v2197_v23  ;;  %1849 = vrsqrt.f32 %v428_v4 }
  0xdd   : > { %526 = vst.msk [vmem:[#allocation2 + $0xa8] sm:$0xff] %vm344_vm0, %v494_v3  ;;  %1851 = vrsqrt.f32 %v425_v10 }
  0xde   : > { %v1842_v11 = vpop.eup %1841  ;;  %525 = vst.msk [vmem:[#allocation2 + $0xa0] sm:$0xff] %vm344_vm0, %v493_v12 }
  0xdf   : > { %v1844_v17 = vpop.eup %1843  ;;  %v496_v15 = vmul.f32 %v1842_v11, %v2210_v31  ;;  %v434_v16 = vpop.xlane.xlu1 %433 }
  0xe0   : > { %v431_v8 = vpop.xlane.xlu0 %430  ;;  %v495_v9 = vmul.f32 %v1844_v17, %v2217_v37  ;;  %1853 = vrsqrt.f32 %v434_v16 }
  0xe1   : > { %528 = vst.msk [vmem:[#allocation2 + $0xb8] sm:$0xff] %vm344_vm0, %v496_v15  ;;  %1855 = vrsqrt.f32 %v431_v8 }
  0xe2   : > { %v1846_v20 = vpop.eup %1845  ;;  %527 = vst.msk [vmem:[#allocation2 + $0xb0] sm:$0xff] %vm344_vm0, %v495_v9 }
  0xe3   : > { %v1848_v23 = vpop.eup %1847  ;;  %v498_v19 = vmul.f32 %v1846_v20, %v2228_v48  ;;  %v440_v24 = vpop.xlane.xlu1 %439 }
  0xe4   : > { %v437_v25 = vpop.xlane.xlu0 %436  ;;  %v497_v27 = vmul.f32 %v1848_v23, %v2231_v49  ;;  %1857 = vrsqrt.f32 %v440_v24 }
  0xe5   : > { %530 = vst.msk [vmem:[#allocation2 + $0xc8] sm:$0xff] %vm344_vm0, %v498_v19  ;;  %1859 = vrsqrt.f32 %v437_v25 }
  0xe6   : > { %v1850_v31 = vpop.eup %1849  ;;  %529 = vst.msk [vmem:[#allocation2 + $0xc0] sm:$0xff] %vm344_vm0, %v497_v27 }
  0xe7   : > { %v1852_v37 = vpop.eup %1851  ;;  %v500_v13 = vmul.f32 %v1850_v31, %v2237_v53 }
  0xe8   : > { %v499_v14 = vmul.f32 %v1852_v37, %v2245_v59 }
  0xe9   : > { %532 = vst.msk [vmem:[#allocation2 + $0xd8] sm:$0xff] %vm344_vm0, %v500_v13 }
  0xea   : > { %v1854_v28 = vpop.eup %1853  ;;  %531 = vst.msk [vmem:[#allocation2 + $0xd0] sm:$0xff] %vm344_vm0, %v499_v14 }
  0xeb   : > { %v1856_v48 = vpop.eup %1855  ;;  %v502_v49 = vmul.f32 %v1854_v28, %v2250_v62 }
  0xec   : > { %v501_v29 = vmul.f32 %v1856_v48, %v2253_v63 }
  0xed   : > { %534 = vst.msk [vmem:[#allocation2 + $0xe8] sm:$0xff] %vm344_vm0, %v502_v49 }
  0xee   : > { %v1858_v30 = vpop.eup %1857  ;;  %533 = vst.msk [vmem:[#allocation2 + $0xe0] sm:$0xff] %vm344_vm0, %v501_v29 }
  0xef   : > { %v1860_v32 = vpop.eup %1859  ;;  %v504_v53 = vmul.f32 %v1858_v30, %v2266_v18 }
  0xf0   : > { %v503_v59 = vmul.f32 %v1860_v32, %v2273_v26 }
  0xf1   : > { %536 = vst.msk [vmem:[#allocation2 + $0xf8] sm:$0xff] %vm344_vm0, %v504_v53 }
  0xf2   : > { %535 = vst.msk [vmem:[#allocation2 + $0xf0] sm:$0xff] %vm344_vm0, %v503_v59 }
  0xf3 PF: > { %v571_v62 = vld [vmem:[%s2769_s3] sm:$0xff]  ;;  %v1975_v63 = vmov 0   ;;  %vm619_vm2 = vcmask 64512   ;;  %v588_v41 = vld [vmem:[#allocation2 + $0x8] sm:$0xff]  ;;  %v589_v47 = vld [vmem:[#allocation2 + $0x10] sm:$0xff]  ;;  %vm1403_vm3 = vcmask 7168  }
  0xf4   : > { %1861 = vset.pattern.permute.xlu0 %v1975_v63  ;;  %v587_v21 = vld [vmem:[#allocation2] sm:$0xff]  ;;  %v604_v42 = vld [vmem:[#allocation2 + $0x88] sm:$0xff]  ;;  %v605_v50 = vld [vmem:[#allocation2 + $0x90] sm:$0xff]  ;;  %p1666_p8 = scmp.ne.s32.totalorder %s1956_s15, 1 }
  0xf5   : > { %574 = vperm.xlu0 %1861, %v571_v62   ;;  %1705 = vmatprep.mubr.msk.f32.mxu0 %vm619_vm2, %v587_v21  ;;  %v603_v18 = vld [vmem:[#allocation2 + $0x80] sm:$0xff]  ;;  %v590_v51 = vld [vmem:[#allocation2 + $0x18] sm:$0xff]  ;;  %v592_v55 = vld [vmem:[#allocation2 + $0x28] sm:$0xff]  ;;  %vm1545_vm4 = vcmask (!%p1666_p8), 0  }
  0xf6   : > { %1729 = vmatprep.mubr.msk.f32.mxu1 %vm619_vm2, %v603_v18  ;;  %v570_v26 = vld [vmem:[%s2051_s9] sm:$0xff]  ;;  %v606_v52 = vld [vmem:[#allocation2 + $0x98] sm:$0xff]  ;;  %v608_v56 = vld [vmem:[#allocation2 + $0xa8] sm:$0xff] }
  0xf7   : > { %v591_v45 = vld [vmem:[#allocation2 + $0x20] sm:$0xff]  ;;  %v593_v57 = vld [vmem:[#allocation2 + $0x30] sm:$0xff]  ;;  %v594_v54 = vld [vmem:[#allocation2 + $0x38] sm:$0xff] }
  0xf8   : > { %v607_v46 = vld [vmem:[#allocation2 + $0xa0] sm:$0xff]  ;;  %v609_v60 = vld [vmem:[#allocation2 + $0xb0] sm:$0xff]  ;;  %v610_v58 = vld [vmem:[#allocation2 + $0xb8] sm:$0xff] }
  0xf9   : > { %v595_v61 = vld [vmem:[#allocation2 + $0x40] sm:$0xff]  ;;  %v596_v6 = vld [vmem:[#allocation2 + $0x48] sm:$0xff]  ;;  %v597_v2 = vld [vmem:[#allocation2 + $0x50] sm:$0xff] }
  0xfa   : > { %v611_v0 = vld [vmem:[#allocation2 + $0xc0] sm:$0xff]  ;;  %v612_v7 = vld [vmem:[#allocation2 + $0xc8] sm:$0xff]  ;;  %v613_v5 = vld [vmem:[#allocation2 + $0xd0] sm:$0xff] }
  0xfb   : > { %v598_v3 = vld [vmem:[#allocation2 + $0x58] sm:$0xff]  ;;  %v599_v10 = vld [vmem:[#allocation2 + $0x60] sm:$0xff]  ;;  %v600_v11 = vld [vmem:[#allocation2 + $0x68] sm:$0xff] }
  0xfc   : > { %v614_v4 = vld [vmem:[#allocation2 + $0xd8] sm:$0xff]  ;;  %v615_v12 = vld [vmem:[#allocation2 + $0xe0] sm:$0xff]  ;;  %v616_v17 = vld [vmem:[#allocation2 + $0xe8] sm:$0xff] }
  0xfd   : > { %v601_v15 = vld [vmem:[#allocation2 + $0x70] sm:$0xff]  ;;  %v602_v8 = vld [vmem:[#allocation2 + $0x78] sm:$0xff] }
  0xfe   : > { %v617_v16 = vld [vmem:[#allocation2 + $0xf0] sm:$0xff]  ;;  %v618_v9 = vld [vmem:[#allocation2 + $0xf8] sm:$0xff] }
 0x174   : > { %v575_v22 = vpop.permute.xlu0 %574 }
 0x175   : > { %v577_v35 = vsub.f32 %v570_v26, %v575_v22 }
 0x177   : > { %v578_v1 = vmul.f32 %v577_v35, %v577_v35 }
 0x179   : > { %v579_v36 = vrot.slane %v578_v1, 4 }
 0x17b   : > { %v580_v38 = vadd.f32 %v579_v36, %v578_v1 }
 0x17d   : > { %v581_v33 = vrot.slane %v580_v38, 2 }
 0x17f   : > { %v582_v34 = vadd.f32 %v581_v33, %v580_v38 }
 0x181   : > { %v583_v39 = vrot.slane %v582_v34, 1 }
 0x183   : > { %v584_v40 = vadd.f32 %v583_v39, %v582_v34 }
 0x185   : > { %1862 = vrsqrt.f32 %v584_v40 }
 0x18f   : > { %v1863_v43 = vpop.eup %1862 }
 0x190   : > { %v586_v44 = vmul.f32 %v1863_v43, %v577_v35 }
 0x192   : > { %1703 = vmatprep.subr.mxu0 %v586_v44  ;;  %1753 = vmatprep.subr.mxu1 %v586_v44 }
 0x193   : > { %1704 = vmatpush3.msra.mxu0 %v586_v44  ;;  %1754 = vmatpush3.msra.mxu1 %v586_v44 }
 0x194   : > { %1706 = vmatmul.mubr.msk.f32.vlgmr.msra.gmra.mrb[0].mxu0 %vm619_vm2, %v588_v41  ;;  %1730 = vmatmul.mubr.msk.f32.vlgmr.msra.gmra.mrb[0].mxu1 %vm619_vm2, %v604_v42 }
 0x195   : > { %1708 = vmatprep.mubr.msk.f32.mxu0 %vm619_vm2, %v589_v47  ;;  %1732 = vmatprep.mubr.msk.f32.mxu1 %vm619_vm2, %v605_v50 }
 0x198   : > { %1709 = vmatmul.mubr.msk.f32.gmra.mrb[2].mxu0 %vm619_vm2, %v590_v51  ;;  %1733 = vmatmul.mubr.msk.f32.gmra.mrb[2].mxu1 %vm619_vm2, %v606_v52 }
 0x199   : > { %1711 = vmatprep.mubr.msk.f32.mxu0 %vm619_vm2, %v591_v45  ;;  %1735 = vmatprep.mubr.msk.f32.mxu1 %vm619_vm2, %v607_v46 }
 0x19c   : > { %1712 = vmatmul.mubr.msk.f32.gmra.mrb[4].mxu0 %vm619_vm2, %v592_v55  ;;  %1736 = vmatmul.mubr.msk.f32.gmra.mrb[4].mxu1 %vm619_vm2, %v608_v56 }
 0x19d   : > { %1714 = vmatprep.mubr.msk.f32.mxu0 %vm619_vm2, %v593_v57  ;;  %1738 = vmatprep.mubr.msk.f32.mxu1 %vm619_vm2, %v609_v60 }
 0x1a0   : > { %1715 = vmatmul.mubr.msk.f32.gmra.mrb[6].mxu0 %vm619_vm2, %v594_v54  ;;  %1739 = vmatmul.mubr.msk.f32.gmra.mrb[6].mxu1 %vm619_vm2, %v610_v58 }
 0x1a1   : > { %1717 = vmatprep.mubr.msk.f32.mxu0 %vm619_vm2, %v595_v61  ;;  %1741 = vmatprep.mubr.msk.f32.mxu1 %vm619_vm2, %v611_v0 }
 0x1a4   : > { %1718 = vmatmul.mubr.msk.f32.gmra.mrb[8].mxu0 %vm619_vm2, %v596_v6  ;;  %1742 = vmatmul.mubr.msk.f32.gmra.mrb[8].mxu1 %vm619_vm2, %v612_v7 }
 0x1a5   : > { %1720 = vmatprep.mubr.msk.f32.mxu0 %vm619_vm2, %v597_v2  ;;  %1744 = vmatprep.mubr.msk.f32.mxu1 %vm619_vm2, %v613_v5 }
 0x1a8   : > { %1721 = vmatmul.mubr.msk.f32.gmra.mrb[10].mxu0 %vm619_vm2, %v598_v3  ;;  %1745 = vmatmul.mubr.msk.f32.gmra.mrb[10].mxu1 %vm619_vm2, %v614_v4 }
 0x1a9   : > { %1723 = vmatprep.mubr.msk.f32.mxu0 %vm619_vm2, %v599_v10  ;;  %1747 = vmatprep.mubr.msk.f32.mxu1 %vm619_vm2, %v615_v12 }
 0x1ac   : > { %1724 = vmatmul.mubr.msk.f32.gmra.mrb[12].mxu0 %vm619_vm2, %v600_v11  ;;  %1748 = vmatmul.mubr.msk.f32.gmra.mrb[12].mxu1 %vm619_vm2, %v616_v17 }
 0x1ad   : > { %1726 = vmatprep.mubr.msk.f32.mxu0 %vm619_vm2, %v601_v15  ;;  %1750 = vmatprep.mubr.msk.f32.mxu1 %vm619_vm2, %v617_v16 }
 0x1b0   : > { %1727 = vmatmul.mubr.msk.f32.gmra.mrb[14].mxu0 %vm619_vm2, %v602_v8  ;;  %1751 = vmatmul.mubr.msk.f32.gmra.mrb[14].mxu1 %vm619_vm2, %v618_v9 }
 0x267   : > { %v1707_v20 = vpop.f32.mrb[0].mxu0  ;;  %v2415_v23 = vpop.f32.mrb[0].mxu1 }
 0x268   : > { %v782_v19 = vpop.f32.mrb[1].mxu0  ;;  %v2417_v24 = vpop.f32.mrb[1].mxu1  ;;  %v942_v13 = vsub.f32 1.0, %v1707_v20  ;;  %v958_v6 = vsub.f32 1.0, %v2415_v23 }
 0x269   : > { %v941_v14 = vsub.f32 1.0, %v782_v19  ;;  %v957_v7 = vsub.f32 1.0, %v2417_v24 }
 0x26a   : > { %v2425_v53 = vmul.f32 0.5, %v942_v13  ;;  %v2473_v19 = vmul.f32 0.5, %v958_v6 }
 0x26b   : > { %v1710_v25 = vpop.f32.mrb[2].mxu0  ;;  %v2419_v27 = vpop.f32.mrb[2].mxu1  ;;  %v2429_v63 = vmul.f32 0.5, %v941_v14  ;;  %v2475_v24 = vmul.f32 0.5, %v957_v7 }
 0x26c   : > { %v792_v31 = vpop.f32.mrb[3].mxu0  ;;  %v2421_v37 = vpop.f32.mrb[3].mxu1  ;;  %v944_v59 = vsub.f32 1.0, %v1710_v25  ;;  %v960_v3 = vsub.f32 1.0, %v2419_v27 }
 0x26d   : > { %v943_v21 = vsub.f32 1.0, %v792_v31  ;;  %v959_v10 = vsub.f32 1.0, %v2421_v37 }
 0x26e   : > { %v2441_v39 = vmul.f32 0.5, %v944_v59  ;;  %v2478_v31 = vmul.f32 0.5, %v960_v3 }
 0x26f   : > { %v1713_v28 = vpop.f32.mrb[4].mxu0  ;;  %v2423_v48 = vpop.f32.mrb[4].mxu1  ;;  %v2445_v43 = vmul.f32 0.5, %v943_v21 }
 0x270   : > { %v946_v49 = vsub.f32 1.0, %v1713_v28  ;;  %v802_v29 = vpop.f32.mrb[5].mxu0  ;;  %v882_v30 = vpop.f32.mrb[5].mxu1  ;;  %v962_v12 = vsub.f32 1.0, %v2423_v48  ;;  %v2482_v28 = vmul.f32 0.5, %v959_v10 }
 0x271   : > { %v945_v32 = vsub.f32 1.0, %v802_v29  ;;  %v961_v11 = vsub.f32 1.0, %v882_v30 }
 0x272   : > { %v2427_v62 = vmul.f32 0.5, %v946_v49  ;;  %v2484_v48 = vmul.f32 0.5, %v962_v12 }
 0x273   : > { %v2431_v18 = vmul.f32 0.5, %v945_v32  ;;  %v1716_v26 = vpop.f32.mrb[6].mxu0  ;;  %v2433_v22 = vpop.f32.mrb[6].mxu1  ;;  %v2486_v49 = vmul.f32 0.5, %v961_v11 }
 0x274   : > { %v1006_v35 = vmin.f32 %v2425_v53, %v2427_v62  ;;  %v948_v1 = vsub.f32 1.0, %v1716_v26  ;;  %v812_v36 = vpop.f32.mrb[7].mxu0  ;;  %v2437_v38 = vpop.f32.mrb[7].mxu1  ;;  %v964_v59 = vsub.f32 1.0, %v2433_v22 }
 0x275   : > { %v1005_v33 = vmin.f32 %v2429_v63, %v2431_v18  ;;  %v947_v34 = vsub.f32 1.0, %v812_v36 }
 0x276   : > { %v2443_v40 = vmul.f32 0.5, %v948_v1  ;;  %v996_v3 = vmul.f32 0.5, %v964_v59 }
 0x277   : > { %v2447_v44 = vmul.f32 0.5, %v947_v34  ;;  %v1719_v41 = vpop.f32.mrb[8].mxu0  ;;  %v1743_v42 = vpop.f32.mrb[8].mxu1 }
 0x278   : > { %v1008_v47 = vmin.f32 %v2441_v39, %v2443_v40  ;;  %v950_v50 = vsub.f32 1.0, %v1719_v41  ;;  %v822_v51 = vpop.f32.mrb[9].mxu0  ;;  %v902_v52 = vpop.f32.mrb[9].mxu1  ;;  %v966_v37 = vsub.f32 1.0, %v1743_v42 }
 0x279   : > { %v1007_v45 = vmin.f32 %v2445_v43, %v2447_v44  ;;  %v949_v46 = vsub.f32 1.0, %v822_v51  ;;  %v965_v14 = vsub.f32 1.0, %v902_v52 }
 0x27a   : > { %v2453_v55 = vmul.f32 0.5, %v950_v50 }
 0x27b   : > { %v2455_v56 = vmul.f32 0.5, %v949_v46  ;;  %v1722_v57 = vpop.f32.mrb[10].mxu0  ;;  %v2457_v60 = vpop.f32.mrb[10].mxu1  ;;  %v2497_v51 = vmul.f32 0.5, %v965_v14 }
 0x27c   : > { %v1010_v54 = vmin.f32 %v1006_v35, %v2453_v55  ;;  %v952_v58 = vsub.f32 1.0, %v1722_v57  ;;  %v832_v61 = vpop.f32.mrb[11].mxu0  ;;  %v2460_v0 = vpop.f32.mrb[11].mxu1 }
 0x27d   : > { %v1009_v2 = vmin.f32 %v1005_v33, %v2455_v56  ;;  %v951_v5 = vsub.f32 1.0, %v832_v61  ;;  %v963_v33 = vsub.f32 1.0, %v2437_v38  ;;  %v967_v46 = vsub.f32 1.0, %v2460_v0 }
 0x27e   : > { %v2466_v4 = vmul.f32 0.5, %v952_v58 }
 0x27f   : > { %v2470_v17 = vmul.f32 0.5, %v951_v5  ;;  %v1725_v15 = vpop.f32.mrb[12].mxu0  ;;  %v1749_v16 = vpop.f32.mrb[12].mxu1 }
 0x280   : > { %v1012_v8 = vmin.f32 %v1008_v47, %v2466_v4  ;;  %v954_v9 = vsub.f32 1.0, %v1725_v15  ;;  %v842_v20 = vpop.f32.mrb[13].mxu0  ;;  %v922_v23 = vpop.f32.mrb[13].mxu1  ;;  %v970_v1 = vsub.f32 1.0, %v1749_v16  ;;  %v2494_v47 = vmul.f32 0.5, %v966_v37 }
 0x281   : > { %v1011_v25 = vmin.f32 %v1007_v45, %v2470_v17  ;;  %v953_v27 = vsub.f32 1.0, %v842_v20  ;;  %v969_v42 = vsub.f32 1.0, %v922_v23  ;;  %v968_v45 = vsub.f32 1.0, %v2457_v60 }
 0x282   : > { %v2480_v13 = vmul.f32 0.5, %v954_v9  ;;  %v2502_v38 = vmul.f32 0.5, %v970_v1  ;;  %v995_v60 = vmul.f32 0.5, %v963_v33  ;;  %v999_v20 = vmul.f32 0.5, %v967_v46 }
 0x283   : > { %v2488_v29 = vmul.f32 0.5, %v953_v27  ;;  %v1728_v30 = vpop.f32.mrb[14].mxu0  ;;  %v1752_v32 = vpop.f32.mrb[14].mxu1  ;;  %v1001_v7 = vmul.f32 0.5, %v969_v42  ;;  %v1000_v15 = vmul.f32 0.5, %v968_v45 }
 0x284   : > { %v1014_v21 = vmin.f32 %v1010_v54, %v2480_v13  ;;  %v956_v26 = vsub.f32 1.0, %v1728_v30  ;;  %v852_v35 = vpop.f32.mrb[15].mxu0  ;;  %v932_v36 = vpop.f32.mrb[15].mxu1  ;;  %v972_v61 = vsub.f32 1.0, %v1752_v32 }
 0x285   : > { %v1013_v34 = vmin.f32 %v1009_v2, %v2488_v29  ;;  %v955_v41 = vsub.f32 1.0, %v852_v35  ;;  %v971_v5 = vsub.f32 1.0, %v932_v36 }
 0x286   : > { %v1018_v50 = vmin.f32 %v1014_v21, %v2473_v19  ;;  %v988_v52 = vmul.f32 0.5, %v956_v26 }
 0x287   : > { %v1017_v22 = vmin.f32 %v1013_v34, %v2475_v24  ;;  %v987_v57 = vmul.f32 0.5, %v955_v41 }
 0x288   : > { %v1016_v54 = vmin.f32 %v1012_v8, %v988_v52  ;;  %v1022_v58 = vmin.f32 %v1018_v50, %v2484_v48  ;;  %v1004_v8 = vmul.f32 0.5, %v972_v61 }
 0x289   : > { %v1015_v6 = vmin.f32 %v1011_v25, %v987_v57  ;;  %v1021_v2 = vmin.f32 %v1017_v22, %v2486_v49  ;;  %v1003_v25 = vmul.f32 0.5, %v971_v5 }
 0x28a   : > { %v1020_v10 = vmin.f32 %v1016_v54, %v2478_v31  ;;  %v1026_v12 = vmin.f32 %v1022_v58, %v2494_v47 }
 0x28b   : > { %v1019_v0 = vmin.f32 %v1015_v6, %v2482_v28  ;;  %v1025_v11 = vmin.f32 %v1021_v2, %v2497_v51 }
 0x28c   : > { %v1030_v16 = vmin.f32 %v1026_v12, %v2502_v38  ;;  %v1024_v9 = vmin.f32 %v1020_v10, %v996_v3 }
 0x28d   : > { %v1029_v23 = vmin.f32 %v1025_v11, %v1001_v7  ;;  %v1023_v27 = vmin.f32 %v1019_v0, %v995_v60 }
 0x28e   : > { %v1028_v37 = vmin.f32 %v1024_v9, %v1000_v15 }
 0x28f   : > { %v1033_v14 = vmin.f32 %v1029_v23, %v1030_v16  ;;  %v1027_v30 = vmin.f32 %v1023_v27, %v999_v20 }
 0x290   : > { %v1032_v32 = vmin.f32 %v1028_v37, %v1004_v8 }
 0x291   : > { %v1031_v59 = vmin.f32 %v1027_v30, %v1003_v25 }
 0x293   : > { %v1034_v21 = vmin.f32 %v1031_v59, %v1032_v32 }
 0x295   : > { %v1035_v26 = vmin.f32 %v1033_v14, %v1034_v21 }
 0x297   : > { %v1036_v35 = vrot.slane %v1035_v26, 4 }
 0x299   : > { %v1037_v1 = vmin.f32 %v1035_v26, %v1036_v35 }
 0x29b   : > { %v1038_v36 = vrot.slane %v1037_v1, 2 }
 0x29d   : > { %v1039_v33 = vmin.f32 %v1037_v1, %v1038_v36 }
 0x29f   : > { %v1040_v34 = vrot.slane %v1039_v33, 1 }
 0x2a1   : > { %v1041_v41 = vmin.f32 %v1039_v33, %v1040_v34 }
 0x2a3   : > { %v1042_v42 = vadd.f32 1e-05, %v1041_v41 }
 0x2a5   : > { %1864 = vrcp.f32 %v1042_v42 }
 0x2af   : > { %v1865_v50 = vpop.eup %1864 }
 0x2b0   : > { %v1045_v22 = vmul.f32 %v1865_v50, %v2429_v63  ;;  %v1046_v45 = vmul.f32 %v1865_v50, %v2425_v53  ;;  %v1047_v46 = vmul.f32 %v1865_v50, %v2445_v43  ;;  %v1048_v54 = vmul.f32 %v1865_v50, %v2441_v39 }
 0x2b1   : > { %v1049_v58 = vmul.f32 %v1865_v50, %v2431_v18  ;;  %v1050_v61 = vmul.f32 %v1865_v50, %v2427_v62  ;;  %v1051_v6 = vmul.f32 %v1865_v50, %v2447_v44  ;;  %v1052_v2 = vmul.f32 %v1865_v50, %v2443_v40 }
 0x2b2   : > { %v1053_v5 = vmul.f32 %v1865_v50, %v2455_v56  ;;  %v1054_v10 = vmul.f32 %v1865_v50, %v2453_v55  ;;  %v1055_v63 = vmul.f32 %v1865_v50, %v2470_v17  ;;  %v2523_v53 = vmul.f32 %v1865_v50, %v2466_v4 }
 0x2b3   : > { %v2526_v43 = vmul.f32 %v1865_v50, %v2488_v29  ;;  %v2529_v18 = vmul.f32 %v1865_v50, %v2480_v13  ;;  %v2531_v62 = vmul.f32 %v1865_v50, %v987_v57  ;;  %v2533_v39 = vmul.f32 %v1865_v50, %v988_v52 }
 0x2b4   : > { %v2536_v40 = vmul.f32 %v1865_v50, %v2475_v24  ;;  %v2539_v44 = vmul.f32 %v1865_v50, %v2473_v19  ;;  %v2542_v55 = vmul.f32 %v1865_v50, %v2482_v28  ;;  %v2545_v56 = vmul.f32 %v1865_v50, %v2478_v31 }
 0x2b5   : > { %v2548_v4 = vmul.f32 %v1865_v50, %v2486_v49  ;;  %v2551_v17 = vmul.f32 %v1865_v50, %v2484_v48  ;;  %v2553_v13 = vmul.f32 %v1865_v50, %v995_v60  ;;  %v2555_v29 = vmul.f32 %v1865_v50, %v996_v3 }
 0x2b6   : > { %v2558_v24 = vmul.f32 %v1865_v50, %v2497_v51  ;;  %v2561_v19 = vmul.f32 %v1865_v50, %v2494_v47  ;;  %v2563_v28 = vmul.f32 %v1865_v50, %v999_v20  ;;  %v2565_v31 = vmul.f32 %v1865_v50, %v1000_v15 }
 0x2b7   : > { %v2567_v52 = vmul.f32 %v1865_v50, %v1001_v7  ;;  %v2570_v49 = vmul.f32 %v1865_v50, %v2502_v38  ;;  %v2572_v48 = vmul.f32 %v1865_v50, %v1003_v25  ;;  %v2574_v57 = vmul.f32 %v1865_v50, %v1004_v8 }
 0x2b8   : > { %v1077_v3 = vsub.f32 1.0, %v1045_v22  ;;  %v1078_v12 = vsub.f32 1.0, %v1046_v45  ;;  %v1079_v51 = vsub.f32 1.0, %v1047_v46  ;;  %v1080_v60 = vsub.f32 1.0, %v1048_v54 }
 0x2b9   : > { %v1081_v11 = vsub.f32 1.0, %v1049_v58  ;;  %v1082_v9 = vsub.f32 1.0, %v1050_v61  ;;  %v1083_v23 = vsub.f32 1.0, %v1051_v6  ;;  %v1084_v25 = vsub.f32 1.0, %v1052_v2 }
 0x2ba   : > { %v1109_v0 = vmul.f32 10.0, %v1077_v3  ;;  %v1110_v47 = vmul.f32 10.0, %v1078_v12  ;;  %v1111_v16 = vmul.f32 10.0, %v1079_v51  ;;  %v1112_v15 = vmul.f32 10.0, %v1080_v60 }
 0x2bb   : > { %v1113_v27 = vmul.f32 10.0, %v1081_v11  ;;  %v1114_v37 = vmul.f32 10.0, %v1082_v9  ;;  %v1085_v14 = vsub.f32 1.0, %v1053_v5  ;;  %v1115_v30 = vmul.f32 10.0, %v1083_v23 }
 0x2bc   : > { %v1141_v20 = vmul.f32 1.442695, %v1109_v0  ;;  %v1143_v7 = vmul.f32 1.442695, %v1110_v47  ;;  %v1145_v38 = vmul.f32 1.442695, %v1111_v16 }
 0x2bd   : > { %v1147_v8 = vmul.f32 1.442695, %v1112_v15  ;;  %v1149_v32 = vmul.f32 1.442695, %v1113_v27  ;;  %v1086_v59 = vsub.f32 1.0, %v1054_v10  ;;  %v1116_v21 = vmul.f32 10.0, %v1084_v25 }
 0x2be   : > { %1866 = vpow2.f32 %v1141_v20  ;;  %v1151_v26 = vmul.f32 1.442695, %v1114_v37  ;;  %v1087_v35 = vsub.f32 1.0, %v1055_v63  ;;  %v1117_v1 = vmul.f32 10.0, %v1085_v14 }
 0x2bf   : > { %1868 = vpow2.f32 %v1143_v7  ;;  %v1153_v36 = vmul.f32 1.442695, %v1115_v30  ;;  %v1088_v33 = vsub.f32 1.0, %v2523_v53  ;;  %v1118_v34 = vmul.f32 10.0, %v1086_v59 }
 0x2c0   : > { %1870 = vpow2.f32 %v1145_v38  ;;  %v1155_v41 = vmul.f32 1.442695, %v1116_v21  ;;  %v1089_v22 = vsub.f32 1.0, %v2526_v43  ;;  %v1119_v45 = vmul.f32 10.0, %v1087_v35 }
 0x2c1   : > { %1872 = vpow2.f32 %v1147_v8  ;;  %v1157_v46 = vmul.f32 1.442695, %v1117_v1  ;;  %v1090_v61 = vsub.f32 1.0, %v2529_v18  ;;  %v1120_v6 = vmul.f32 10.0, %v1088_v33 }
 0x2c2   : > { %1874 = vpow2.f32 %v1149_v32  ;;  %v1159_v2 = vmul.f32 1.442695, %v1118_v34  ;;  %v1091_v63 = vsub.f32 1.0, %v2531_v62  ;;  %v1121_v53 = vmul.f32 10.0, %v1089_v22 }
 0x2c3   : > { %1876 = vpow2.f32 %v1151_v26  ;;  %v1161_v43 = vmul.f32 1.442695, %v1119_v45  ;;  %v1092_v51 = vsub.f32 1.0, %v2533_v39  ;;  %v1122_v60 = vmul.f32 10.0, %v1090_v61 }
 0x2c4   : > { %1878 = vpow2.f32 %v1153_v36  ;;  %v1163_v18 = vmul.f32 1.442695, %v1120_v6  ;;  %v1093_v11 = vsub.f32 1.0, %v2536_v40  ;;  %v1123_v16 = vmul.f32 10.0, %v1091_v63 }
 0x2c5   : > { %1880 = vpow2.f32 %v1155_v41  ;;  %v1165_v62 = vmul.f32 1.442695, %v1121_v53  ;;  %v1094_v20 = vsub.f32 1.0, %v2539_v44  ;;  %v1124_v7 = vmul.f32 10.0, %v1092_v51 }
 0x2c6   : > { %1882 = vpow2.f32 %v1157_v46  ;;  %v1167_v39 = vmul.f32 1.442695, %v1122_v60  ;;  %v1095_v38 = vsub.f32 1.0, %v2542_v55  ;;  %v1125_v25 = vmul.f32 10.0, %v1093_v11 }
 0x2c7   : > { %1884 = vpow2.f32 %v1159_v2  ;;  %v1169_v40 = vmul.f32 1.442695, %v1123_v16  ;;  %v1096_v14 = vsub.f32 1.0, %v2545_v56  ;;  %v1126_v30 = vmul.f32 10.0, %v1094_v20 }
 0x2c8   : > { %v2577_v42 = vpop.eup %1866  ;;  %1886 = vpow2.f32 %v1161_v43  ;;  %v1171_v44 = vmul.f32 1.442695, %v1124_v7  ;;  %v1097_v21 = vsub.f32 1.0, %v2548_v4  ;;  %v1127_v26 = vmul.f32 10.0, %v1095_v38 }
 0x2c9   : > { %v2579_v50 = vpop.eup %1868  ;;  %1888 = vpow2.f32 %v1163_v18  ;;  %v1173_v55 = vmul.f32 1.442695, %v1125_v25  ;;  %v1098_v36 = vsub.f32 1.0, %v2551_v17  ;;  %v1128_v33 = vmul.f32 10.0, %v1096_v14 }
 0x2ca   : > { %v1205_v54 = vadd.f32 %v2579_v50, %v2577_v42  ;;  %v2584_v58 = vpop.eup %1870  ;;  %1890 = vpow2.f32 %v1165_v62  ;;  %v1175_v56 = vmul.f32 1.442695, %v1126_v30  ;;  %v1099_v22 = vsub.f32 1.0, %v2553_v13 }
 0x2cb   : > { %v2588_v10 = vpop.eup %1872  ;;  %1892 = vpow2.f32 %v1167_v39  ;;  %v1129_v45 = vmul.f32 10.0, %v1097_v21  ;;  %v1177_v4 = vmul.f32 1.442695, %v1127_v26  ;;  %v1100_v61 = vsub.f32 1.0, %v2555_v29 }
 0x2cc   : > { %v1206_v5 = vadd.f32 %v2584_v58, %v1205_v54  ;;  %v2592_v12 = vpop.eup %1874  ;;  %1894 = vpow2.f32 %v1169_v40  ;;  %v1130_v6 = vmul.f32 10.0, %v1098_v36  ;;  %v1179_v17 = vmul.f32 1.442695, %v1128_v33 }
 0x2cd   : > { %v2596_v47 = vpop.eup %1876  ;;  %1896 = vpow2.f32 %v1171_v44  ;;  %v1101_v63 = vsub.f32 1.0, %v2558_v24  ;;  %v1131_v53 = vmul.f32 10.0, %v1099_v22  ;;  %v1181_v13 = vmul.f32 1.442695, %v1129_v45 }
 0x2ce   : > { %v1207_v3 = vadd.f32 %v2588_v10, %v1206_v5  ;;  %v2600_v15 = vpop.eup %1878  ;;  %1898 = vpow2.f32 %v1173_v55  ;;  %v1102_v51 = vsub.f32 1.0, %v2561_v19  ;;  %v1132_v60 = vmul.f32 10.0, %v1100_v61 }
 0x2cf   : > { %v2604_v27 = vpop.eup %1880  ;;  %1900 = vpow2.f32 %v1175_v56  ;;  %v1183_v29 = vmul.f32 1.442695, %v1130_v6  ;;  %v1103_v11 = vsub.f32 1.0, %v2563_v28  ;;  %v1133_v16 = vmul.f32 10.0, %v1101_v63 }
 0x2d0   : > { %v1208_v0 = vadd.f32 %v2592_v12, %v1207_v3  ;;  %v2608_v8 = vpop.eup %1882  ;;  %1902 = vpow2.f32 %v1177_v4  ;;  %v1185_v24 = vmul.f32 1.442695, %v1131_v53  ;;  %v1104_v20 = vsub.f32 1.0, %v2565_v31 }
 0x2d1   : > { %v2612_v59 = vpop.eup %1884  ;;  %1904 = vpow2.f32 %v1179_v17  ;;  %v1134_v7 = vmul.f32 10.0, %v1102_v51  ;;  %v1187_v19 = vmul.f32 1.442695, %v1132_v60  ;;  %v1105_v38 = vsub.f32 1.0, %v2567_v52 }
 0x2d2   : > { %v1209_v9 = vadd.f32 %v2596_v47, %v1208_v0  ;;  %v2616_v1 = vpop.eup %1886  ;;  %1906 = vpow2.f32 %v1181_v13  ;;  %v1135_v25 = vmul.f32 10.0, %v1103_v11  ;;  %v1189_v28 = vmul.f32 1.442695, %v1133_v16 }
 0x2d3   : > { %v2620_v41 = vpop.eup %1888  ;;  %1908 = vpow2.f32 %v1183_v29  ;;  %v1106_v14 = vsub.f32 1.0, %v2570_v49  ;;  %v1136_v30 = vmul.f32 10.0, %v1104_v20  ;;  %v1191_v31 = vmul.f32 1.442695, %v1134_v7 }
 0x2d4   : > { %v1210_v23 = vadd.f32 %v2600_v15, %v1209_v9  ;;  %v2624_v54 = vpop.eup %1890  ;;  %1910 = vpow2.f32 %v1185_v24  ;;  %v1107_v21 = vsub.f32 1.0, %v2572_v48  ;;  %v1137_v26 = vmul.f32 10.0, %v1105_v38 }
 0x2d5   : > { %v2628_v5 = vpop.eup %1892  ;;  %1912 = vpow2.f32 %v1187_v19  ;;  %v1193_v52 = vmul.f32 1.442695, %v1135_v25  ;;  %v1108_v36 = vsub.f32 1.0, %v2574_v57  ;;  %v1138_v33 = vmul.f32 10.0, %v1106_v14 }
 0x2d6   : > { %v1211_v37 = vadd.f32 %v2604_v27, %v1210_v23  ;;  %v2632_v3 = vpop.eup %1894  ;;  %1914 = vpow2.f32 %v1189_v28  ;;  %v1195_v49 = vmul.f32 1.442695, %v1136_v30  ;;  %v1139_v22 = vmul.f32 10.0, %v1107_v21 }
 0x2d7   : > { %v2636_v0 = vpop.eup %1896  ;;  %1916 = vpow2.f32 %v1191_v31  ;;  %v1197_v45 = vmul.f32 1.442695, %v1137_v26  ;;  %v1199_v61 = vmul.f32 1.442695, %v1138_v33 }
 0x2d8   : > { %v1212_v32 = vadd.f32 %v2608_v8, %v1211_v37  ;;  %v2640_v9 = vpop.eup %1898  ;;  %1918 = vpow2.f32 %v1193_v52 }
 0x2d9   : > { %v2644_v23 = vpop.eup %1900  ;;  %1920 = vpow2.f32 %v1195_v49 }
 0x2da   : > { %v1213_v35 = vadd.f32 %v2612_v59, %v1212_v32  ;;  %v2648_v37 = vpop.eup %1902  ;;  %1922 = vpow2.f32 %v1197_v45 }
 0x2db   : > { %v2652_v32 = vpop.eup %1904  ;;  %1924 = vpow2.f32 %v1199_v61 }
 0x2dc   : > { %v1214_v34 = vadd.f32 %v2616_v1, %v1213_v35  ;;  %v1907_v35 = vpop.eup %1906 }
 0x2de   : > { %v1215_v46 = vadd.f32 %v2620_v41, %v1214_v34  ;;  %v2657_v34 = vpop.eup %1908 }
 0x2df   : > { %v1911_v48 = vpop.eup %1910 }
 0x2e0   : > { %v1216_v2 = vadd.f32 %v2624_v54, %v1215_v46  ;;  %v1140_v46 = vmul.f32 10.0, %v1108_v36  ;;  %v1913_v17 = vpop.eup %1912 }
 0x2e1   : > { %v1915_v63 = vpop.eup %1914 }
 0x2e2   : > { %v1217_v43 = vadd.f32 %v2628_v5, %v1216_v2  ;;  %v1201_v2 = vmul.f32 1.442695, %v1139_v22  ;;  %v1203_v53 = vmul.f32 1.442695, %v1140_v46 }
 0x2e4   : > { %v1218_v18 = vadd.f32 %v2632_v3, %v1217_v43  ;;  %v1917_v43 = vpop.eup %1916  ;;  %1926 = vpow2.f32 %v1201_v2 }
 0x2e5   : > { %v1919_v60 = vpop.eup %1918  ;;  %1928 = vpow2.f32 %v1203_v53 }
 0x2e6   : > { %v1219_v62 = vadd.f32 %v2636_v0, %v1218_v18  ;;  %v1921_v18 = vpop.eup %1920 }
 0x2e7   : > { %v1923_v16 = vpop.eup %1922 }
 0x2e8   : > { %v1220_v39 = vadd.f32 %v2640_v9, %v1219_v62  ;;  %v1925_v62 = vpop.eup %1924 }
 0x2ea   : > { %v1221_v40 = vadd.f32 %v2644_v23, %v1220_v39 }
 0x2ec   : > { %v1222_v44 = vadd.f32 %v2648_v37, %v1221_v40 }
 0x2ee   : > { %v1223_v55 = vadd.f32 %v2652_v32, %v1222_v44  ;;  %v1927_v7 = vpop.eup %1926 }
 0x2ef   : > { %v1929_v39 = vpop.eup %1928 }
 0x2f0   : > { %v1224_v56 = vadd.f32 %v1907_v35, %v1223_v55 }
 0x2f2   : > { %v1225_v4 = vadd.f32 %v2657_v34, %v1224_v56 }
 0x2f4   : > { %v1226_v6 = vadd.f32 %v1911_v48, %v1225_v4 }
 0x2f6   : > { %v1227_v57 = vadd.f32 %v1913_v17, %v1226_v6 }
 0x2f8   : > { %v1228_v13 = vadd.f32 %v1915_v63, %v1227_v57  ;;  %v1285_v57 = vld [vmem:[#allocation3 + $0x50] sm:$0xff] }
 0x2fa   : > { %v1229_v51 = vadd.f32 %v1917_v43, %v1228_v13 }
 0x2fc   : > { %v1230_v29 = vadd.f32 %v1919_v60, %v1229_v51  ;;  %v1278_v51 = vld [vmem:[#allocation3 + $0x18] sm:$0xff] }
 0x2fe   : > { %v1231_v11 = vadd.f32 %v1921_v18, %v1230_v29 }
 0x300   : > { %v1232_v24 = vadd.f32 %v1923_v16, %v1231_v11 }
 0x302   : > { %v1233_v20 = vadd.f32 %v1925_v62, %v1232_v24  ;;  %v1279_v24 = vld [vmem:[#allocation3 + $0x20] sm:$0xff] }
 0x304   : > { %v1234_v19 = vadd.f32 %v1927_v7, %v1233_v20 }
 0x306   : > { %v1235_v38 = vadd.f32 %v1929_v39, %v1234_v19 }
 0x308   : > { %v1236_v25 = vrot.slane %v1235_v38, 4 }
 0x30a   : > { %v1237_v28 = vadd.f32 %v1236_v25, %v1235_v38  ;;  %v1280_v38 = vld [vmem:[#allocation3 + $0x28] sm:$0xff]  ;;  %v1291_v25 = vld [vmem:[#allocation3 + $0x80] sm:$0xff] }
 0x30c   : > { %v1238_v40 = vrot.slane %v1237_v28, 2 }
 0x30e   : > { %v1239_v14 = vadd.f32 %v1238_v40, %v1237_v28 }
 0x310   : > { %v1240_v30 = vrot.slane %v1239_v14, 1 }
 0x312   : > { %v1241_v31 = vadd.f32 %v1240_v30, %v1239_v14 }
 0x314   : > { %1930 = vrcp.f32 %v1241_v31  ;;  %v1281_v31 = vld [vmem:[#allocation3 + $0x30] sm:$0xff] }
 0x31e   : > { %v1931_v44 = vpop.eup %1930 }
 0x31f   : > { %v1244_v21 = vmul.f32 %v1931_v44, %v2579_v50  ;;  %v1243_v26 = vmul.f32 %v1931_v44, %v2577_v42  ;;  %v1255_v52 = vmul.f32 %v1931_v44, %v2624_v54  ;;  %v1257_v55 = vmul.f32 %v1931_v44, %v2632_v3 }
 0x320   : > { %v1259_v36 = vmul.f32 %v1931_v44, %v2640_v9  ;;  %v1261_v33 = vmul.f32 %v1931_v44, %v2648_v37  ;;  %v1263_v49 = vmul.f32 %v1931_v44, %v1907_v35  ;;  %v1245_v56 = vmul.f32 %v1931_v44, %v2584_v58 }
 0x321   : > { %1309 = vmax.xlane.f32.xlu1 %v1244_v21  ;;  %1307 = vmax.xlane.f32.xlu0 %v1243_v26  ;;  %v1253_v22 = vmul.f32 %v1931_v44, %v2616_v1  ;;  %v1265_v45 = vmul.f32 %v1931_v44, %v1911_v48  ;;  %v1267_v4 = vmul.f32 %v1931_v44, %v1915_v63 }
 0x322   : > { %v1269_v50 = vmul.f32 %v1931_v44, %v1919_v60  ;;  %v1271_v46 = vmul.f32 %v1931_v44, %v1923_v16  ;;  %v1258_v42 = vmul.f32 %v1931_v44, %v2636_v0  ;;  %v1273_v54 = vmul.f32 %v1931_v44, %v1927_v7  ;;  %v1287_v60 = vld [vmem:[#allocation3 + $0x60] sm:$0xff] }
 0x323   : > { %v1260_v3 = vmul.f32 %v1931_v44, %v2644_v23  ;;  %v1262_v9 = vmul.f32 %v1931_v44, %v2652_v32  ;;  %v1264_v37 = vmul.f32 %v1931_v44, %v2657_v34  ;;  %v1266_v35 = vmul.f32 %v1931_v44, %v1913_v17 }
 0x324   : > { %v1268_v61 = vmul.f32 %v1931_v44, %v1917_v43  ;;  %v1270_v58 = vmul.f32 %v1931_v44, %v1921_v18  ;;  %v1246_v1 = vmul.f32 %v1931_v44, %v2588_v10  ;;  %v1272_v48 = vmul.f32 %v1931_v44, %v1925_v62  ;;  %v1289_v62 = vld [vmem:[#allocation3 + $0x70] sm:$0xff] }
 0x325   : > { %1311 = vmax.xlane.f32.xlu1 %v1245_v56  ;;  %1327 = vmax.xlane.f32.xlu0 %v1253_v22  ;;  %v1274_v6 = vmul.f32 %v1931_v44, %v1929_v39  ;;  %v1247_v0 = vmul.f32 %v1931_v44, %v2592_v12  ;;  %v1248_v2 = vmul.f32 %v1931_v44, %v2596_v47 }
 0x326   : > { %v1249_v23 = vmul.f32 %v1931_v44, %v2600_v15  ;;  %v1250_v32 = vmul.f32 %v1931_v44, %v2604_v27  ;;  %v1251_v10 = vmul.f32 %v1931_v44, %v2608_v8  ;;  %v1252_v12 = vmul.f32 %v1931_v44, %v2612_v59  ;;  %v1276_v27 = vld [vmem:[#allocation3 + $0x8] sm:$0xff]  ;;  %v1275_v8 = vld [vmem:[#allocation3] sm:$0xff] }
 0x327   : > { %v1254_v47 = vmul.f32 %v1931_v44, %v2620_v41  ;;  %v1256_v15 = vmul.f32 %v1931_v44, %v2628_v5  ;;  %v1277_v5 = vld [vmem:[#allocation3 + $0x10] sm:$0xff] }
 0x328   : > { %v1293_v44 = vld [vmem:[#allocation3 + $0x90] sm:$0xff] }
 0x329   : > { %1313 = vmax.xlane.f32.xlu1 %v1246_v1  ;;  %1331 = vmax.xlane.f32.xlu0 %v1255_v52 }
 0x32d   : > { %1315 = vmax.xlane.f32.xlu1 %v1247_v0  ;;  %1335 = vmax.xlane.f32.xlu0 %v1257_v55 }
 0x331   : > { %1317 = vmax.xlane.f32.xlu1 %v1248_v2  ;;  %1339 = vmax.xlane.f32.xlu0 %v1259_v36  ;;  %v1282_v36 = vld [vmem:[#allocation3 + $0x38] sm:$0xff] }
 0x335   : > { %1319 = vmax.xlane.f32.xlu1 %v1249_v23  ;;  %1343 = vmax.xlane.f32.xlu0 %v1261_v33  ;;  %v1295_v33 = vld [vmem:[#allocation3 + $0xa0] sm:$0xff] }
 0x339   : > { %1321 = vmax.xlane.f32.xlu1 %v1250_v32  ;;  %1347 = vmax.xlane.f32.xlu0 %v1263_v49 }
 0x33d   : > { %1323 = vmax.xlane.f32.xlu1 %v1251_v10  ;;  %1351 = vmax.xlane.f32.xlu0 %v1265_v45  ;;  %v1288_v10 = vld [vmem:[#allocation3 + $0x68] sm:$0xff] }
 0x341   : > { %1325 = vmax.xlane.f32.xlu1 %v1252_v12  ;;  %1355 = vmax.xlane.f32.xlu0 %v1267_v4  ;;  %v1283_v4 = vld [vmem:[#allocation3 + $0x40] sm:$0xff] }
 0x342   : > { %v1303_v12 = vld [vmem:[#allocation3 + $0xe0] sm:$0xff] }
 0x345   : > { %1329 = vmax.xlane.f32.xlu1 %v1254_v47  ;;  %1359 = vmax.xlane.f32.xlu0 %v1269_v50  ;;  %v1297_v50 = vld [vmem:[#allocation3 + $0xb0] sm:$0xff] }
 0x349   : > { %1333 = vmax.xlane.f32.xlu1 %v1256_v15  ;;  %1363 = vmax.xlane.f32.xlu0 %v1271_v46 }
 0x34d   : > { %1337 = vmax.xlane.f32.xlu1 %v1258_v42  ;;  %1367 = vmax.xlane.f32.xlu0 %v1273_v54 }
 0x351   : > { %1341 = vmax.xlane.f32.xlu1 %v1260_v3 }
 0x355   : > { %1345 = vmax.xlane.f32.xlu1 %v1262_v9  ;;  %v1284_v9 = vld [vmem:[#allocation3 + $0x48] sm:$0xff] }
 0x359   : > { %1349 = vmax.xlane.f32.xlu1 %v1264_v37  ;;  %v1299_v37 = vld [vmem:[#allocation3 + $0xc0] sm:$0xff] }
 0x35d   : > { %1353 = vmax.xlane.f32.xlu1 %v1266_v35 }
 0x361   : > { %1357 = vmax.xlane.f32.xlu1 %v1268_v61 }
 0x365   : > { %1361 = vmax.xlane.f32.xlu1 %v1270_v58 }
 0x369   : > { %1365 = vmax.xlane.f32.xlu1 %v1272_v48  ;;  %v1286_v48 = vld [vmem:[#allocation3 + $0x58] sm:$0xff] }
 0x36d   : > { %1369 = vmax.xlane.f32.xlu1 %v1274_v6  ;;  %v1301_v6 = vld [vmem:[#allocation3 + $0xd0] sm:$0xff] }
 0x3ae   : > { %v1310_v59 = vpop.xlane.xlu1 %1309  ;;  %v1308_v41 = vpop.xlane.xlu0 %1307 }
 0x3af   : > { %v1372_v34 = vmax.f32 %v1276_v27, %v1310_v59  ;;  %v1371_v17 = vmax.f32 %v1275_v8, %v1308_v41  ;;  %v1290_v59 = vld [vmem:[#allocation3 + $0x78] sm:$0xff]  ;;  %v1305_v41 = vld [vmem:[#allocation3 + $0xf0] sm:$0xff] }
 0x3b1   : > { %1405 = vst.msk [vmem:[#allocation3 + $0x8] sm:$0xff] %vm1403_vm3, %v1372_v34  ;;  %1404 = vst.msk [vmem:[#allocation3] sm:$0xff] %vm1403_vm3, %v1371_v17 }
 0x3b2   : > { %v1312_v63 = vpop.xlane.xlu1 %1311  ;;  %v1328_v53 = vpop.xlane.xlu0 %1327 }
 0x3b3   : > { %v1373_v13 = vmax.f32 %v1277_v5, %v1312_v63  ;;  %v1381_v43 = vmax.f32 %v1285_v57, %v1328_v53  ;;  %v1292_v63 = vld [vmem:[#allocation3 + $0x88] sm:$0xff] }
 0x3b5   : > { %1406 = vst.msk [vmem:[#allocation3 + $0x10] sm:$0xff] %vm1403_vm3, %v1373_v13  ;;  %1414 = vst.msk [vmem:[#allocation3 + $0x50] sm:$0xff] %vm1403_vm3, %v1381_v43  ;;  %v1294_v43 = vld [vmem:[#allocation3 + $0x98] sm:$0xff] }
 0x3b6   : > { %v1314_v29 = vpop.xlane.xlu1 %1313  ;;  %v1332_v18 = vpop.xlane.xlu0 %1331 }
 0x3b7   : > { %v1374_v11 = vmax.f32 %v1278_v51, %v1314_v29  ;;  %v1383_v16 = vmax.f32 %v1287_v60, %v1332_v18  ;;  %v1296_v29 = vld [vmem:[#allocation3 + $0xa8] sm:$0xff] }
 0x3b9   : > { %1407 = vst.msk [vmem:[#allocation3 + $0x18] sm:$0xff] %vm1403_vm3, %v1374_v11  ;;  %1416 = vst.msk [vmem:[#allocation3 + $0x60] sm:$0xff] %vm1403_vm3, %v1383_v16  ;;  %v1298_v16 = vld [vmem:[#allocation3 + $0xb8] sm:$0xff] }
 0x3ba   : > { %v1316_v20 = vpop.xlane.xlu1 %1315  ;;  %v1336_v7 = vpop.xlane.xlu0 %1335 }
 0x3bb   : > { %v1375_v19 = vmax.f32 %v1279_v24, %v1316_v20  ;;  %v1385_v39 = vmax.f32 %v1289_v62, %v1336_v7  ;;  %v1300_v20 = vld [vmem:[#allocation3 + $0xc8] sm:$0xff] }
 0x3bd   : > { %1408 = vst.msk [vmem:[#allocation3 + $0x20] sm:$0xff] %vm1403_vm3, %v1375_v19  ;;  %1418 = vst.msk [vmem:[#allocation3 + $0x70] sm:$0xff] %vm1403_vm3, %v1385_v39  ;;  %v1302_v39 = vld [vmem:[#allocation3 + $0xd8] sm:$0xff] }
 0x3be   : > { %v1318_v28 = vpop.xlane.xlu1 %1317  ;;  %v1340_v40 = vpop.xlane.xlu0 %1339 }
 0x3bf   : > { %v1376_v14 = vmax.f32 %v1280_v38, %v1318_v28  ;;  %v1387_v30 = vmax.f32 %v1291_v25, %v1340_v40  ;;  %v1304_v28 = vld [vmem:[#allocation3 + $0xe8] sm:$0xff] }
 0x3c1   : > { %1409 = vst.msk [vmem:[#allocation3 + $0x28] sm:$0xff] %vm1403_vm3, %v1376_v14  ;;  %1420 = vst.msk [vmem:[#allocation3 + $0x80] sm:$0xff] %vm1403_vm3, %v1387_v30  ;;  %v1306_v30 = vld [vmem:[#allocation3 + $0xf8] sm:$0xff] }
 0x3c2   : > { %v1320_v21 = vpop.xlane.xlu1 %1319  ;;  %v1344_v26 = vpop.xlane.xlu0 %1343 }
 0x3c3   : > { %v1377_v52 = vmax.f32 %v1281_v31, %v1320_v21  ;;  %v1389_v55 = vmax.f32 %v1293_v44, %v1344_v26  ;;  %v1440_v21 = vld [vmem:[#allocation3] sm:$0xff] (!%p1666_p8)  ;;  %v1441_v26 = vld [vmem:[#allocation3 + $0x8] sm:$0xff] (!%p1666_p8) }
 0x3c5   : > { %1410 = vst.msk [vmem:[#allocation3 + $0x30] sm:$0xff] %vm1403_vm3, %v1377_v52  ;;  %1422 = vst.msk [vmem:[#allocation3 + $0x90] sm:$0xff] %vm1403_vm3, %v1389_v55  ;;  %v1442_v52 = vld [vmem:[#allocation3 + $0x10] sm:$0xff] (!%p1666_p8)  ;;  %v1443_v55 = vld [vmem:[#allocation3 + $0x18] sm:$0xff] (!%p1666_p8) }
 0x3c6   : > { %v1322_v49 = vpop.xlane.xlu1 %1321  ;;  %v1348_v56 = vpop.xlane.xlu0 %1347 }
 0x3c7   : > { %v1378_v22 = vmax.f32 %v1282_v36, %v1322_v49  ;;  %v1391_v45 = vmax.f32 %v1295_v33, %v1348_v56  ;;  %v1472_v36 = vsel (!%p1666_p8), %vm1403_vm3, %v1440_v21, 0.0  ;;  %v1473_v33 = vsel (!%p1666_p8), %vm1403_vm3, %v1441_v26, 0.0  ;;  %v1444_v56 = vld [vmem:[#allocation3 + $0x20] sm:$0xff] (!%p1666_p8) }
 0x3c8   : > { %v1475_v49 = vsel (!%p1666_p8), %vm1403_vm3, %v1442_v52, 0.0 }
 0x3c9   : > { %1411 = vst.msk [vmem:[#allocation3 + $0x38] sm:$0xff] %vm1403_vm3, %v1378_v22  ;;  %1424 = vst.msk [vmem:[#allocation3 + $0xa0] sm:$0xff] %vm1403_vm3, %v1391_v45  ;;  %v1474_v22 = vadd.f32 (!%p1666_p8), %v1473_v33, %v1472_v36  ;;  %v1477_v45 = vsel (!%p1666_p8), %vm1403_vm3, %v1443_v55, 0.0 }
 0x3ca   : > { %v1324_v46 = vpop.xlane.xlu1 %1323  ;;  %v1352_v42 = vpop.xlane.xlu0 %1351 }
 0x3cb   : > { %v1379_v54 = vmax.f32 %v1283_v4, %v1324_v46  ;;  %v1393_v3 = vmax.f32 %v1297_v50, %v1352_v42  ;;  %v1445_v4 = vld [vmem:[#allocation3 + $0x28] sm:$0xff] (!%p1666_p8)  ;;  %v1476_v50 = vadd.f32 (!%p1666_p8), %v1475_v49, %v1474_v22  ;;  %v1479_v46 = vsel (!%p1666_p8), %vm1403_vm3, %v1444_v56, 0.0 }
 0x3cc   : > { %v1446_v42 = vld [vmem:[#allocation3 + $0x30] sm:$0xff] (!%p1666_p8) }
 0x3cd   : > { %1412 = vst.msk [vmem:[#allocation3 + $0x40] sm:$0xff] %vm1403_vm3, %v1379_v54  ;;  %1426 = vst.msk [vmem:[#allocation3 + $0xb0] sm:$0xff] %vm1403_vm3, %v1393_v3  ;;  %v1478_v54 = vadd.f32 (!%p1666_p8), %v1477_v45, %v1476_v50  ;;  %v1481_v3 = vsel (!%p1666_p8), %vm1403_vm3, %v1445_v4, 0.0 }
 0x3ce   : > { %v1326_v35 = vpop.xlane.xlu1 %1325  ;;  %v1356_v61 = vpop.xlane.xlu0 %1355 }
 0x3cf   : > { %v1380_v58 = vmax.f32 %v1284_v9, %v1326_v35  ;;  %v1395_v1 = vmax.f32 %v1299_v37, %v1356_v61  ;;  %v1480_v37 = vadd.f32 (!%p1666_p8), %v1479_v46, %v1478_v54  ;;  %v1483_v35 = vsel (!%p1666_p8), %vm1403_vm3, %v1446_v42, 0.0 }
 0x3d0   : > { %v1447_v9 = vld [vmem:[#allocation3 + $0x38] sm:$0xff] (!%p1666_p8) }
 0x3d1   : > { %1413 = vst.msk [vmem:[#allocation3 + $0x48] sm:$0xff] %vm1403_vm3, %v1380_v58  ;;  %1428 = vst.msk [vmem:[#allocation3 + $0xc0] sm:$0xff] %vm1403_vm3, %v1395_v1  ;;  %v1482_v58 = vadd.f32 (!%p1666_p8), %v1481_v3, %v1480_v37  ;;  %v1485_v1 = vsel (!%p1666_p8), %vm1403_vm3, %v1447_v9, 0.0 }
 0x3d2   : > { %v1330_v0 = vpop.xlane.xlu1 %1329  ;;  %v1360_v2 = vpop.xlane.xlu0 %1359 }
 0x3d3   : > { %v1382_v23 = vmax.f32 %v1286_v48, %v1330_v0  ;;  %v1397_v32 = vmax.f32 %v1301_v6, %v1360_v2  ;;  %v1484_v6 = vadd.f32 (!%p1666_p8), %v1483_v35, %v1482_v58  ;;  %v1450_v2 = vld [vmem:[#allocation3 + $0x50] sm:$0xff] (!%p1666_p8) }
 0x3d4   : > { %v1448_v61 = vld [vmem:[#allocation3 + $0x40] sm:$0xff] (!%p1666_p8) }
 0x3d5   : > { %1415 = vst.msk [vmem:[#allocation3 + $0x58] sm:$0xff] %vm1403_vm3, %v1382_v23  ;;  %1430 = vst.msk [vmem:[#allocation3 + $0xd0] sm:$0xff] %vm1403_vm3, %v1397_v32  ;;  %v1487_v0 = vsel (!%p1666_p8), %vm1403_vm3, %v1448_v61, 0.0  ;;  %v1486_v23 = vadd.f32 (!%p1666_p8), %v1485_v1, %v1484_v6 }
 0x3d6   : > { %v1334_v47 = vpop.xlane.xlu1 %1333  ;;  %v1364_v15 = vpop.xlane.xlu0 %1363 }
 0x3d7   : > { %v1384_v27 = vmax.f32 %v1288_v10, %v1334_v47  ;;  %v1399_v8 = vmax.f32 %v1303_v12, %v1364_v15  ;;  %v1488_v12 = vadd.f32 (!%p1666_p8), %v1487_v0, %v1486_v23  ;;  %v1491_v47 = vsel (!%p1666_p8), %vm1403_vm3, %v1450_v2, 0.0  ;;  %v1452_v15 = vld [vmem:[#allocation3 + $0x60] sm:$0xff] (!%p1666_p8) }
 0x3d8   : > { %v1449_v48 = vld [vmem:[#allocation3 + $0x48] sm:$0xff] (!%p1666_p8)  ;;  %v1464_v55 = vld [vmem:[#allocation3 + $0xc0] sm:$0xff] (!%p1666_p8) }
 0x3d9   : > { %1417 = vst.msk [vmem:[#allocation3 + $0x68] sm:$0xff] %vm1403_vm3, %v1384_v27  ;;  %1432 = vst.msk [vmem:[#allocation3 + $0xe0] sm:$0xff] %vm1403_vm3, %v1399_v8  ;;  %v1489_v32 = vsel (!%p1666_p8), %vm1403_vm3, %v1449_v48, 0.0  ;;  %v1519_v22 = vsel (!%p1666_p8), %vm1403_vm3, %v1464_v55, 0.0 }
 0x3da   : > { %v1338_v34 = vpop.xlane.xlu1 %1337  ;;  %v1368_v17 = vpop.xlane.xlu0 %1367  ;;  %v1490_v27 = vadd.f32 (!%p1666_p8), %v1489_v32, %v1488_v12 }
 0x3db   : > { %v1386_v5 = vmax.f32 %v1290_v59, %v1338_v34  ;;  %v1401_v57 = vmax.f32 %v1305_v41, %v1368_v17  ;;  %v1495_v34 = vsel (!%p1666_p8), %vm1403_vm3, %v1452_v15, 0.0  ;;  %v1454_v17 = vld [vmem:[#allocation3 + $0x70] sm:$0xff] (!%p1666_p8) }
 0x3dc   : > { %v1451_v10 = vld [vmem:[#allocation3 + $0x58] sm:$0xff] (!%p1666_p8)  ;;  %v1492_v41 = vadd.f32 (!%p1666_p8), %v1491_v47, %v1490_v27  ;;  %v1466_v45 = vld [vmem:[#allocation3 + $0xd0] sm:$0xff] (!%p1666_p8) }
 0x3dd   : > { %1419 = vst.msk [vmem:[#allocation3 + $0x78] sm:$0xff] %vm1403_vm3, %v1386_v5  ;;  %1434 = vst.msk [vmem:[#allocation3 + $0xf0] sm:$0xff] %vm1403_vm3, %v1401_v57  ;;  %v1493_v8 = vsel (!%p1666_p8), %vm1403_vm3, %v1451_v10, 0.0  ;;  %v1523_v54 = vsel (!%p1666_p8), %vm1403_vm3, %v1466_v45, 0.0 }
 0x3de   : > { %v1342_v53 = vpop.xlane.xlu1 %1341  ;;  %v1494_v5 = vadd.f32 (!%p1666_p8), %v1493_v8, %v1492_v41 }
 0x3df   : > { %v1388_v13 = vmax.f32 %v1292_v63, %v1342_v53 }
 0x3e0   : > { %v1453_v59 = vld [vmem:[#allocation3 + $0x68] sm:$0xff] (!%p1666_p8)  ;;  %v1496_v53 = vadd.f32 (!%p1666_p8), %v1495_v34, %v1494_v5  ;;  %v1468_v3 = vld [vmem:[#allocation3 + $0xe0] sm:$0xff] (!%p1666_p8) }
 0x3e1   : > { %1421 = vst.msk [vmem:[#allocation3 + $0x88] sm:$0xff] %vm1403_vm3, %v1388_v13  ;;  %v1497_v57 = vsel (!%p1666_p8), %vm1403_vm3, %v1453_v59, 0.0  ;;  %v1499_v13 = vsel (!%p1666_p8), %vm1403_vm3, %v1454_v17, 0.0  ;;  %v1527_v58 = vsel (!%p1666_p8), %vm1403_vm3, %v1468_v3, 0.0 }
 0x3e2   : > { %v1346_v51 = vpop.xlane.xlu1 %1345 }
 0x3e3   : > { %v1390_v60 = vmax.f32 %v1294_v43, %v1346_v51  ;;  %v1456_v43 = vld [vmem:[#allocation3 + $0x80] sm:$0xff] (!%p1666_p8)  ;;  %v1498_v51 = vadd.f32 (!%p1666_p8), %v1497_v57, %v1496_v53 }
 0x3e4   : > { %v1455_v63 = vld [vmem:[#allocation3 + $0x78] sm:$0xff] (!%p1666_p8)  ;;  %v1470_v1 = vld [vmem:[#allocation3 + $0xf0] sm:$0xff] (!%p1666_p8) }
 0x3e5   : > { %1423 = vst.msk [vmem:[#allocation3 + $0x98] sm:$0xff] %vm1403_vm3, %v1390_v60  ;;  %v1501_v60 = vsel (!%p1666_p8), %vm1403_vm3, %v1455_v63, 0.0  ;;  %v1531_v23 = vsel (!%p1666_p8), %vm1403_vm3, %v1470_v1, 0.0 }
 0x3e6   : > { %v1350_v18 = vpop.xlane.xlu1 %1349 }
 0x3e7   : > { %v1392_v11 = vmax.f32 %v1296_v29, %v1350_v18  ;;  %v1500_v18 = vadd.f32 (!%p1666_p8), %v1499_v13, %v1498_v51 }
 0x3e8   : > { %v1457_v29 = vld [vmem:[#allocation3 + $0x88] sm:$0xff] (!%p1666_p8) }
 0x3e9   : > { %1425 = vst.msk [vmem:[#allocation3 + $0xa8] sm:$0xff] %vm1403_vm3, %v1392_v11  ;;  %v1503_v11 = vsel (!%p1666_p8), %vm1403_vm3, %v1456_v43, 0.0 }
 0x3ea   : > { %v1354_v24 = vpop.xlane.xlu1 %1353 }
 0x3eb   : > { %v1394_v62 = vmax.f32 %v1298_v16, %v1354_v24  ;;  %v1458_v16 = vld [vmem:[#allocation3 + $0x90] sm:$0xff] (!%p1666_p8)  ;;  %v1502_v24 = vadd.f32 (!%p1666_p8), %v1501_v60, %v1500_v18 }
 0x3ed   : > { %1427 = vst.msk [vmem:[#allocation3 + $0xb8] sm:$0xff] %vm1403_vm3, %v1394_v62  ;;  %v1505_v62 = vsel (!%p1666_p8), %vm1403_vm3, %v1457_v29, 0.0 }
 0x3ee   : > { %v1358_v7 = vpop.xlane.xlu1 %1357 }
 0x3ef   : > { %v1396_v19 = vmax.f32 %v1300_v20, %v1358_v7  ;;  %v1459_v20 = vld [vmem:[#allocation3 + $0x98] sm:$0xff] (!%p1666_p8)  ;;  %v1504_v7 = vadd.f32 (!%p1666_p8), %v1503_v11, %v1502_v24 }
 0x3f1   : > { %1429 = vst.msk [vmem:[#allocation3 + $0xc8] sm:$0xff] %vm1403_vm3, %v1396_v19  ;;  %v1507_v19 = vsel (!%p1666_p8), %vm1403_vm3, %v1458_v16, 0.0 }
 0x3f2   : > { %v1362_v38 = vpop.xlane.xlu1 %1361 }
 0x3f3   : > { %v1398_v25 = vmax.f32 %v1302_v39, %v1362_v38  ;;  %v1460_v39 = vld [vmem:[#allocation3 + $0xa0] sm:$0xff] (!%p1666_p8)  ;;  %v1506_v38 = vadd.f32 (!%p1666_p8), %v1505_v62, %v1504_v7 }
 0x3f4   : > { %v1463_v21 = vld [vmem:[#allocation3 + $0xb8] sm:$0xff] (!%p1666_p8) }
 0x3f5   : > { %1431 = vst.msk [vmem:[#allocation3 + $0xd8] sm:$0xff] %vm1403_vm3, %v1398_v25  ;;  %v1509_v25 = vsel (!%p1666_p8), %vm1403_vm3, %v1459_v20, 0.0  ;;  %v1517_v33 = vsel (!%p1666_p8), %vm1403_vm3, %v1463_v21, 0.0 }
 0x3f6   : > { %v1366_v40 = vpop.xlane.xlu1 %1365 }
 0x3f7   : > { %v1400_v14 = vmax.f32 %v1304_v28, %v1366_v40  ;;  %1439 = sbr.rel (%p1666_p8) target bundleno = 1075 (0x433), region = 44  ;;  %v1461_v28 = vld [vmem:[#allocation3 + $0xa8] sm:$0xff] (!%p1666_p8)  ;;  %v1508_v40 = vadd.f32 (!%p1666_p8), %v1507_v19, %v1506_v38 }
 0x3f8   : > { %v1465_v49 = vld [vmem:[#allocation3 + $0xc8] sm:$0xff] (!%p1666_p8) }
 0x3f9   : > { %1433 = vst.msk [vmem:[#allocation3 + $0xe8] sm:$0xff] %vm1403_vm3, %v1400_v14  ;;  %v1511_v14 = vsel (!%p1666_p8), %vm1403_vm3, %v1460_v39, 0.0  ;;  %v1521_v50 = vsel (!%p1666_p8), %vm1403_vm3, %v1465_v49, 0.0 }
 0x3fa   : > { %v1370_v31 = vpop.xlane.xlu1 %1369 }
 0x3fb   : > { %v1402_v44 = vmax.f32 %v1306_v30, %v1370_v31  ;;  %v1462_v30 = vld [vmem:[#allocation3 + $0xb0] sm:$0xff] (!%p1666_p8)  ;;  %v1510_v31 = vadd.f32 (!%p1666_p8), %v1509_v25, %v1508_v40 }
 0x3fc   : > { %v1515_v52 = vsel (!%p1666_p8), %vm1403_vm3, %v1462_v30, 0.0  ;;  %v1467_v46 = vld [vmem:[#allocation3 + $0xd8] sm:$0xff] (!%p1666_p8) }
 0x3fd   : > { %1435 = vst.msk [vmem:[#allocation3 + $0xf8] sm:$0xff] %vm1403_vm3, %v1402_v44  ;;  %v1513_v44 = vsel (!%p1666_p8), %vm1403_vm3, %v1461_v28, 0.0  ;;  %v1512_v26 = vadd.f32 (!%p1666_p8), %v1511_v14, %v1510_v31  ;;  %v1525_v37 = vsel (!%p1666_p8), %vm1403_vm3, %v1467_v46, 0.0 }
 0x3ff   : > { %v1514_v36 = vadd.f32 %v1513_v44, %v1512_v26 }
 0x400   : > { %v1469_v35 = vld [vmem:[#allocation3 + $0xe8] sm:$0xff] }
 0x401   : > { %v1516_v56 = vadd.f32 %v1515_v52, %v1514_v36  ;;  %v1529_v6 = vsel %vm1403_vm3, %v1469_v35, 0.0 }
 0x403   : > { %v1518_v4 = vadd.f32 %v1517_v33, %v1516_v56 }
 0x404   : > { %v1471_v0 = vld [vmem:[#allocation3 + $0xf8] sm:$0xff] }
 0x405   : > { %v1520_v42 = vadd.f32 %v1519_v22, %v1518_v4  ;;  %v1533_v10 = vsel %vm1403_vm3, %v1471_v0, 0.0 }
 0x407   : > { %v1522_v9 = vadd.f32 %v1521_v50, %v1520_v42 }
 0x409   : > { %v1524_v61 = vadd.f32 %v1523_v54, %v1522_v9 }
 0x40b   : > { %v1526_v48 = vadd.f32 %v1525_v37, %v1524_v61 }
 0x40d   : > { %v1528_v2 = vadd.f32 %v1527_v58, %v1526_v48 }
 0x40f   : > { %v1530_v32 = vadd.f32 %v1529_v6, %v1528_v2 }
 0x411   : > { %v1532_v12 = vadd.f32 %v1531_v23, %v1530_v32 }
 0x413   : > { %v1534_v47 = vadd.f32 %v1533_v10, %v1532_v12 }
 0x415   : > { %v1535_v15 = vrot.slane %v1534_v47, 4 }
 0x417   : > { %v1536_v27 = vadd.f32 %v1535_v15, %v1534_v47 }
 0x419   : > { %v1537_v8 = vrot.slane %v1536_v27, 2 }
 0x41b   : > { %v1538_v59 = vadd.f32 %v1537_v8, %v1536_v27 }
 0x41d   : > { %v1539_v41 = vrot.slane %v1538_v59, 1 }
 0x41f   : > { %v1540_v34 = vadd.f32 %v1539_v41, %v1538_v59 }
 0x421   : > { %v1541_v17 = vmul.f32 0.00390625, %v1540_v34 }
 0x423   : > { %1932 = vlog2.f32 %v1541_v17 }
 0x42d   : > { %v1933_v5 = vpop.eup %1932 }
 0x42e   : > { %v1543_v57 = vmul.f32 0.6931472, %v1933_v5 }
 0x430   : > { %v1544_v63 = vsub.f32 0.0, %v1543_v57 }
 0x432   : > { %1546 = vst.msk [vmem:[%s236_s6] sm:$0x1] %vm1545_vm4, %v1544_v63 }
 0x433 PF: > { %s14_s19 = sadd.s32 1, %s1972_s19   ;;  %s2771_s15 = smov %s1964_s17 }
 0x434   : > { %p11_p9 = scmp.ge.s32.totalorder %s14_s19, 6   ;;  %s2772_s16 = smov %s1968_s18 }
 0x435   : > { %s2773_s17 = smov %s2776_s20  ;;  %s2774_s18 = smov %s2780_s21 }
 0x436   :  { %13 = sbr.rel (!%p11_p9) target bundleno = 3 (0x3), region = 77 }

</bundles_post_ra>
